<compile_context>
chip_gen: v6e
topology: v6e:2x2x1
jax: 0.10.0
libtpu: 0.0.40
codegen_flags: <defaults>
</compile_context>

<pallas_src>
import jax
import jax.numpy as jnp
from jax.experimental import pallas as pl
from jax.experimental.pallas import tpu as pltpu

IN_FEATURES = 8
HIDDEN = 120
HIDDEN_PAD = 128  # padded to the 128-lane vreg width


def nn_agent_kernel(x_ref, w1_ref, b1_ref, w2_ref, b2_ref, w3_ref, b3_ref, o_ref):
    # Transposed dataflow: features/hidden on sublanes, batch on lanes.
    xt = x_ref[...]                                                        # (8, TB) f32

    h1 = jnp.dot(w1_ref[...], xt, preferred_element_type=jnp.float32) + b1_ref[...]
    h1 = jnp.maximum(h1, 0.0)                                              # (128, TB)

    h2 = jnp.dot(w2_ref[...], h1, preferred_element_type=jnp.float32) + b2_ref[...]
    h2 = jnp.maximum(h2, 0.0)                                              # (128, TB)

    # Final 120->1 layer: VPU multiply + sublane (XLU) reduction.  Result is
    # already a lane-dense (1, TB) row; sigmoid runs on one value per row.
    s = jnp.sum(h2 * w3_ref[...], axis=0, keepdims=True)                   # (1, TB)
    o_ref[...] = jax.nn.sigmoid(s + b3_ref[0, 0])                          # (1, TB)


def nn_agent_forward(x, packed, *, tb=1024):
    """x: (B, 8) float32. packed: padded/folded/transposed params from pack_params()."""
    w1t, b1c = packed["w1t"], packed["b1c"]
    w2t, b2c = packed["w2t"], packed["b2c"]
    w3c, b3s = packed["w3c"], packed["b3s"]

    B = x.shape[0]
    B_pad = ((B + tb - 1) // tb) * tb
    n_blocks = B_pad // tb

    xt = x.T                                   # (8, B): batch on lanes
    if B_pad != B:
        xt = jnp.pad(xt, ((0, 0), (0, B_pad - B)))

    # Weights/biases: constant block index -> stay resident in VMEM across steps.
    resident = lambda shape: pl.BlockSpec(shape, lambda i: (0, 0))

    flops = 2 * B_pad * (IN_FEATURES * HIDDEN_PAD + HIDDEN_PAD * HIDDEN_PAD + HIDDEN_PAD)
    bytes_accessed = 4 * (xt.size + w1t.size + b1c.size + w2t.size + b2c.size
                          + w3c.size + b3s.size + B_pad)

    out = pl.pallas_call(
        nn_agent_kernel,
        out_shape=jax.ShapeDtypeStruct((1, B_pad), jnp.float32),
        grid=(n_blocks,),
        in_specs=[
            pl.BlockSpec((IN_FEATURES, tb), lambda i: (0, i)),       # x tile (8, tb)
            resident((HIDDEN_PAD, IN_FEATURES)),                     # w1^T (with /500 folded)
            resident((HIDDEN_PAD, 1)),                               # b1 column
            resident((HIDDEN_PAD, HIDDEN_PAD)),                      # w2^T
            resident((HIDDEN_PAD, 1)),                               # b2 column
            resident((HIDDEN_PAD, 1)),                               # w3 column
            pl.BlockSpec(memory_space=pltpu.MemorySpace.SMEM),       # b3 scalar (1,1)
        ],
        out_specs=pl.BlockSpec((1, tb), lambda i: (0, i)),           # lane-dense output row
        compiler_params=pltpu.CompilerParams(
            dimension_semantics=("parallel",)),                      # shard batch over TCs (v7x)
        cost_estimate=pl.CostEstimate(
            flops=flops, transcendentals=B_pad, bytes_accessed=bytes_accessed),
    )(xt, w1t, b1c, w2t, b2c, w3c, b3s)

    # (1, B_pad) -> (B, 1); each lane already holds exactly one useful value.
    return out.reshape(B_pad, 1)[:B]


def init_params(key):
    """Deterministic synthetic init matching nn.Linear shapes.

    torch stores weight as (out, in); we store the transpose (in, out) here and
    re-transpose in pack_params.  PyTorch-style uniform(-1/sqrt(fan_in), ...) bounds.
    """
    def linear(key, fan_in, fan_out):
        kw, kb = jax.random.split(key)
        bound = 1.0 / jnp.sqrt(fan_in)
        w = jax.random.uniform(kw, (fan_in, fan_out), jnp.float32, -bound, bound)
        b = jax.random.uniform(kb, (fan_out,), jnp.float32, -bound, bound)
        return w, b

    k1, k2, k3 = jax.random.split(key, 3)
    w1, b1 = linear(k1, IN_FEATURES, HIDDEN)
    w2, b2 = linear(k2, HIDDEN, HIDDEN)
    w3, b3 = linear(k3, HIDDEN, 1)
    return {"w1": w1, "b1": b1, "w2": w2, "b2": b2, "w3": w3, "b3": b3}


def pack_params(params):
    """Offline parameter prep for the transposed dataflow:
       * pad hidden 120->128 with zeros (exact: zeros stay zero through ReLU),
       * fold the /500 input scaling into w1,
       * store weights transposed ((out, in) layout) and biases as columns,
       * keep b3 as a (1,1) scalar for SMEM."""
    w1t = (jnp.zeros((HIDDEN_PAD, IN_FEATURES), jnp.float32)
           .at[:HIDDEN, :].set((params["w1"] / 500.0).T))
    b1c = jnp.zeros((HIDDEN_PAD, 1), jnp.float32).at[:HIDDEN, 0].set(params["b1"])
    w2t = (jnp.zeros((HIDDEN_PAD, HIDDEN_PAD), jnp.float32)
           .at[:HIDDEN, :HIDDEN].set(params["w2"].T))
    b2c = jnp.zeros((HIDDEN_PAD, 1), jnp.float32).at[:HIDDEN, 0].set(params["b2"])
    w3c = jnp.zeros((HIDDEN_PAD, 1), jnp.float32).at[:HIDDEN, 0].set(params["w3"][:, 0])
    b3s = params["b3"].reshape(1, 1).astype(jnp.float32)
    return {"w1t": w1t, "b1c": b1c, "w2t": w2t, "b2c": b2c, "w3c": w3c, "b3s": b3s}


def reference_forward(x, params):
    """Plain-JAX reference (unpadded, unfolded, untransposed) for sanity checking."""
    h = x / 500.0
    h = jnp.maximum(h @ params["w1"] + params["b1"], 0.0)
    h = jnp.maximum(h @ params["w2"] + params["b2"], 0.0)
    return jax.nn.sigmoid(h @ params["w3"] + params["b3"])


if __name__ == "__main__":
    key = jax.random.PRNGKey(0)
    kp, kx = jax.random.split(key)

    params = init_params(kp)
    packed = pack_params(params)

    # Batched evaluation (many flappy-bird states per call) amortizes dispatch +
    # weight-DMA overhead; tb=1024 -> 2 grid blocks so v7x can use both cores.
    B = 2048
    x = jax.random.uniform(kx, (B, IN_FEATURES), jnp.float32, 0.0, 500.0)

    out = jax.block_until_ready(nn_agent_forward(x, packed, tb=1024))

    ref = reference_forward(x, params)
    assert out.shape == (B, 1)
    assert jnp.allclose(out, ref, atol=1e-5, rtol=1e-5), "mismatch vs reference"

    print("KERNEL_OK")
</pallas_src>

<mosaic_0001>
module attributes {stable_mosaic.version = 11 : i64} {
  func.func @nn_agent_kernel(%arg0: i32, %arg1: memref<8x1024xf32, #tpu.memory_space<vmem>>, %arg2: memref<128x8xf32, #tpu.memory_space<vmem>>, %arg3: memref<128x1xf32, #tpu.memory_space<vmem>>, %arg4: memref<128x128xf32, #tpu.memory_space<vmem>>, %arg5: memref<128x1xf32, #tpu.memory_space<vmem>>, %arg6: memref<128x1xf32, #tpu.memory_space<vmem>>, %arg7: memref<1x1xf32, #tpu.memory_space<smem>>, %arg8: memref<1x1024xf32, #tpu.memory_space<vmem>>) attributes {dimension_semantics = [#tpu.dimension_semantics<parallel>], iteration_bounds = array<i64: 2>, scalar_prefetch = 0 : i64, scratch_operands = 0 : i64, tpu.core_type = #tpu.core_type<tc>, window_params = [{transform_indices = @transform_0, window_bounds = array<i64: 8, 1024>}, {pipeline_mode = #tpu.pipeline_mode<synchronous>, transform_indices = @transform_1, window_bounds = array<i64: 128, 8>}, {pipeline_mode = #tpu.pipeline_mode<synchronous>, transform_indices = @transform_2, window_bounds = array<i64: 128, 1>}, {pipeline_mode = #tpu.pipeline_mode<synchronous>, transform_indices = @transform_3, window_bounds = array<i64: 128, 128>}, {pipeline_mode = #tpu.pipeline_mode<synchronous>, transform_indices = @transform_4, window_bounds = array<i64: 128, 1>}, {pipeline_mode = #tpu.pipeline_mode<synchronous>, transform_indices = @transform_5, window_bounds = array<i64: 128, 1>}, {transform_indices = @transform_6, window_bounds = array<i64: 1, 1>}, {transform_indices = @transform_7, window_bounds = array<i64: 1, 1024>}]} {
    %c0 = arith.constant 0 : index
    %c0_0 = arith.constant 0 : index
    %0 = vector.load %arg1[%c0, %c0_0] : memref<8x1024xf32, #tpu.memory_space<vmem>>, vector<8x1024xf32>
    %c0_1 = arith.constant 0 : index
    %c0_2 = arith.constant 0 : index
    %1 = vector.load %arg2[%c0_1, %c0_2] : memref<128x8xf32, #tpu.memory_space<vmem>>, vector<128x8xf32>
    %cst = arith.constant dense<0.000000e+00> : vector<128x1024xf32>
    %2 = tpu.matmul %1, %0, %cst {dimension_numbers = #tpu.dot_dimension_numbers<[1], [0], [0], [1], [0, 0, 1, 1], [], []>} : vector<128x8xf32>, vector<8x1024xf32>, vector<128x1024xf32> -> vector<128x1024xf32>
    %c0_3 = arith.constant 0 : index
    %c0_4 = arith.constant 0 : index
    %3 = vector.load %arg3[%c0_3, %c0_4] : memref<128x1xf32, #tpu.memory_space<vmem>>, vector<128x1xf32>
    %4 = vector.broadcast %3 : vector<128x1xf32> to vector<128x1024xf32>
    %5 = arith.addf %2, %4 : vector<128x1024xf32>
    %cst_5 = arith.constant 0.000000e+00 : f32
    %6 = vector.broadcast %cst_5 : f32 to vector<128x1024xf32>
    %7 = arith.maximumf %5, %6 : vector<128x1024xf32>
    %c0_6 = arith.constant 0 : index
    %c0_7 = arith.constant 0 : index
    %8 = vector.load %arg4[%c0_6, %c0_7] : memref<128x128xf32, #tpu.memory_space<vmem>>, vector<128x128xf32>
    %cst_8 = arith.constant dense<0.000000e+00> : vector<128x1024xf32>
    %9 = tpu.matmul %8, %7, %cst_8 {dimension_numbers = #tpu.dot_dimension_numbers<[1], [0], [0], [1], [0, 0, 1, 1], [], []>} : vector<128x128xf32>, vector<128x1024xf32>, vector<128x1024xf32> -> vector<128x1024xf32>
    %c0_9 = arith.constant 0 : index
    %c0_10 = arith.constant 0 : index
    %10 = vector.load %arg5[%c0_9, %c0_10] : memref<128x1xf32, #tpu.memory_space<vmem>>, vector<128x1xf32>
    %11 = vector.broadcast %10 : vector<128x1xf32> to vector<128x1024xf32>
    %12 = arith.addf %9, %11 : vector<128x1024xf32>
    %cst_11 = arith.constant 0.000000e+00 : f32
    %13 = vector.broadcast %cst_11 : f32 to vector<128x1024xf32>
    %14 = arith.maximumf %12, %13 : vector<128x1024xf32>
    %c0_12 = arith.constant 0 : index
    %c0_13 = arith.constant 0 : index
    %15 = vector.load %arg6[%c0_12, %c0_13] : memref<128x1xf32, #tpu.memory_space<vmem>>, vector<128x1xf32>
    %16 = vector.broadcast %15 : vector<128x1xf32> to vector<128x1024xf32>
    %17 = arith.mulf %14, %16 : vector<128x1024xf32>
    %cst_14 = arith.constant dense<0.000000e+00> : vector<1024xf32>
    %18 = vector.multi_reduction <add>, %17, %cst_14 [0] : vector<128x1024xf32> to vector<1024xf32>
    %19 = vector.shape_cast %18 : vector<1024xf32> to vector<1x1024xf32>
    %c0_15 = arith.constant 0 : index
    %c0_16 = arith.constant 0 : index
    %20 = memref.load %arg7[%c0_15, %c0_16] : memref<1x1xf32, #tpu.memory_space<smem>>
    %21 = vector.broadcast %20 : f32 to vector<1x1024xf32>
    %22 = arith.addf %19, %21 : vector<1x1024xf32>
    %23 = arith.negf %22 : vector<1x1024xf32>
    %24 = math.exp %23 : vector<1x1024xf32>
    %cst_17 = arith.constant 1.000000e+00 : f32
    %25 = vector.broadcast %cst_17 : f32 to vector<1x1024xf32>
    %26 = arith.addf %25, %24 : vector<1x1024xf32>
    %27 = arith.divf %25, %26 : vector<1x1024xf32>
    %c0_18 = arith.constant 0 : index
    %c0_19 = arith.constant 0 : index
    %28 = vector.load %arg8[%c0_18, %c0_19] : memref<1x1024xf32, #tpu.memory_space<vmem>>, vector<1x1024xf32>
    tpu.vector_store %arg8[%c0_18, %c0_19], %27 {strides = array<i32>} : memref<1x1024xf32, #tpu.memory_space<vmem>>, vector<1x1024xf32>,
    return
  }
  func.func @transform_0(%arg0: i32) -> (i32, i32) {
    %c0_i32 = arith.constant 0 : i32
    %c0_i32_0 = arith.constant 0 : i32
    return %c0_i32, %arg0 : i32, i32
  }
  func.func @transform_1(%arg0: i32) -> (i32, i32) {
    %c0_i32 = arith.constant 0 : i32
    %c0_i32_0 = arith.constant 0 : i32
    %c0_i32_1 = arith.constant 0 : i32
    return %c0_i32, %c0_i32_0 : i32, i32
  }
  func.func @transform_2(%arg0: i32) -> (i32, i32) {
    %c0_i32 = arith.constant 0 : i32
    %c0_i32_0 = arith.constant 0 : i32
    %c0_i32_1 = arith.constant 0 : i32
    return %c0_i32, %c0_i32_0 : i32, i32
  }
  func.func @transform_3(%arg0: i32) -> (i32, i32) {
    %c0_i32 = arith.constant 0 : i32
    %c0_i32_0 = arith.constant 0 : i32
    %c0_i32_1 = arith.constant 0 : i32
    return %c0_i32, %c0_i32_0 : i32, i32
  }
  func.func @transform_4(%arg0: i32) -> (i32, i32) {
    %c0_i32 = arith.constant 0 : i32
    %c0_i32_0 = arith.constant 0 : i32
    %c0_i32_1 = arith.constant 0 : i32
    return %c0_i32, %c0_i32_0 : i32, i32
  }
  func.func @transform_5(%arg0: i32) -> (i32, i32) {
    %c0_i32 = arith.constant 0 : i32
    %c0_i32_0 = arith.constant 0 : i32
    %c0_i32_1 = arith.constant 0 : i32
    return %c0_i32, %c0_i32_0 : i32, i32
  }
  func.func @transform_6(%arg0: i32) -> (i32, i32) {
    %c0_i32 = arith.constant 0 : i32
    %c0_i32_0 = arith.constant 0 : i32
    %c0_i32_1 = arith.constant 0 : i32
    return %c0_i32, %c0_i32_0 : i32, i32
  }
  func.func @transform_7(%arg0: i32) -> (i32, i32) {
    %c0_i32 = arith.constant 0 : i32
    %c0_i32_0 = arith.constant 0 : i32
    return %c0_i32, %arg0 : i32, i32
  }
}

</mosaic_0001>

<bundles_post_ra>
// kernel: tpu_custom_call.1
= control target key start
LH: loop header
LB: loop body
LE: loop exit
PB: predicated region body
PF: predicated region fallthrough
CT: control target
= control target key end

     0   :  { %s4479_s0 = inlined_call_operand.vmem [shape: f32[8,2048], index: 0, kind: input, shape index: {}]   ;;  %s4480_s1 = inlined_call_operand.vmem [shape: f32[128,8], index: 1, kind: input, shape index: {}]   ;;  %s4481_s2 = inlined_call_operand.vmem [shape: f32[128,1], index: 2, kind: input, shape index: {}]   ;;  %s4482_s3 = inlined_call_operand.vmem [shape: f32[128,128], index: 3, kind: input, shape index: {}]   ;;  %s4483_s4 = inlined_call_operand.vmem [shape: f32[128,1], index: 4, kind: input, shape index: {}]   ;;  %s4484_s5 = inlined_call_operand.vmem [shape: f32[128,1], index: 5, kind: input, shape index: {}]   ;;  %s4485_s6 = inlined_call_operand.<no memory space> [shape: f32[1,1], index: 6, kind: input, shape index: {}]   ;;  %s4486_s7 = inlined_call_operand.hbm [shape: f32[1,2048], index: 7, kind: output, shape index: {}]  }
   0x1   :  { %12 = sst [smem:[#allocation2]] %s4485_s6 }
   0x2   :  { %13 = vsyncpa [#allocation4], 0 }
   0x3   :  { %15 = vsyncpa [#allocation4 + $0x1], 0  ;;  %s2959_s26 = smov 0   ;;  %s2961_s27 = smov 0  }
   0x4   :  { %s2963_s28 = smov 0   ;;  %s2965_s29 = smov 0  }
   0x5 LB: > { %s2980_s6 = sadd.s32 4294967295, %s2910_s29   ;;  %s2689_s30 = sadd.s32 4294967294, %s2910_s29   ;;  %s2910_s29 = sphi %s2965_s29, %s4648_s29   ;;  %s2906_s28 = sphi %s2963_s28, %s4647_s28   ;;  %s2902_s27 = sphi %s2961_s27, %s4646_s27   ;;  %s2898_s26 = sphi %s2959_s26, %s4645_s26  }
   0x6   : > { %s2984_s8 = sadd.s32 1, %s2910_s29   ;;  %s180_s9 = sadd.s32 1, %s2906_s28 }
   0x7   : > { %s177_s10 = ssub.s32 %s2910_s29, %s2984_s8  ;;  %p190_p0 = scmp.ne.s32.totalorder %s2906_s28, %s2902_s27 }
   0x8   : > { %p178_p1 = scmp.eq.s32.totalorder %s177_s10, 0  ;;  %p191_p2 = scmp.eq.s32.totalorder %s2980_s6, 1 }
   0x9   : > { %p196_p3 = scmp.ne.s32.totalorder %s2902_s27, %s2898_s26  ;;  %p197_p4 = scmp.eq.s32.totalorder %s2689_s30, 1 }
   0xa   : > { %s2995_s11 = scalar_select %p178_p1, %s2906_s28, %s180_s9  }
   0xb   : > { %p2997_p5 = por %p191_p2, %p190_p0  ;;  %p3001_p6 = por %p197_p4, %p196_p3 }
   0xc   : > { %p2692_p7 = scmp.ge.s32.totalorder %s2910_s29, 1  ;;  %p242_p8 = scmp.lt.s32.totalorder %s2910_s29, 3 }
   0xe   : > { %p243_p9 = pnand %p2692_p7, %p242_p8 }
  0x10   : > { %246 = sbr.rel (%p243_p9) target bundleno = 744 (0x2e8), region = 48 }
  0x15   : > { %s2694_s14 = sshll.u32 %s2980_s6, 3  ;;  %v4487_v0 = vmov 0.0   ;;  %v2913_v1 = vmov 0   ;;  %v320_v2 = vld [vmem:[%s4481_s2 + $0x78] sm:$0xff]  ;;  %v318_v3 = vld [vmem:[%s4481_s2 + $0x68] sm:$0xff]  ;;  %v3022_v4 = vld [vmem:[%s4480_s1] sm:$0xff] }
  0x16   : > { %p275_p10 = scmp.lt.s32.totalorder %s2694_s14, 15  ;;  %514 = vmatprep.mubr.f32.mxu0 %v4487_v0  ;;  %675 = vmatprep.mubr.f32.mxu1 %v4487_v0  ;;  %vm401_vm0 = vcmask 64512   ;;  %v3033_v13 = vld [vmem:[%s4480_s1 + $0x8] sm:$0xff]  ;;  %v319_v14 = vld [vmem:[%s4481_s2 + $0x70] sm:$0xff]  ;;  %v317_v15 = vld [vmem:[%s4481_s2 + $0x60] sm:$0xff]  ;;  %s271_s15 = sand.u32 1, %s2902_s27  }
  0x17   : > { %2816 = vset.pattern.permute.xlu0 %v2913_v1  ;;  %2817 = vset.pattern.permute.xlu1 %v2913_v1  ;;  %v3050_v16 = vld [vmem:[%s4480_s1 + $0x10] sm:$0xff]  ;;  %v316_v17 = vld [vmem:[%s4481_s2 + $0x58] sm:$0xff]  ;;  %v314_v20 = vld [vmem:[%s4481_s2 + $0x48] sm:$0xff]  ;;  %s2693_s16 = sshll.u32 %s271_s15, 3  ;;  %s2773_s17 = sshll.u32 %s2980_s6, 7 }
  0x18   : > { %s4650_s14 = smov (!%p275_p10, %s2694_s14), 15  ;;  %398 = vperm.xlu0 %2816, %v320_v2   ;;  %388 = vperm.xlu1 %2817, %v318_v3   ;;  %v315_v18 = vld [vmem:[%s4481_s2 + $0x50] sm:$0xff]  ;;  %v3067_v19 = vld [vmem:[%s4480_s1 + $0x18] sm:$0xff]  ;;  %v313_v21 = vld [vmem:[%s4481_s2 + $0x40] sm:$0xff]  ;;  %s273_s18 = scalar_lea.vmem [#allocation3], %s2693_s16 }
  0x19   : > { %s2695_s19 = sshll.u32 %s4650_s14, 3  ;;  %v3084_v22 = vld [vmem:[%s4480_s1 + $0x20] sm:$0xff]  ;;  %v312_v23 = vld [vmem:[%s4481_s2 + $0x38] sm:$0xff]  ;;  %v311_v24 = vld [vmem:[%s4481_s2 + $0x30] sm:$0xff]  ;;  %s4263_s14 = sld [smem:[#allocation2]] }
  0x1a   : > { %s278_s22 = scalar_lea.vmem %s4479_s0, %s2695_s19  ;;  %v3101_v25 = vld [vmem:[%s4480_s1 + $0x28] sm:$0xff]  ;;  %v309_v27 = vld [vmem:[%s4481_s2 + $0x20] sm:$0xff]  ;;  %v3118_v28 = vld [vmem:[%s4480_s1 + $0x30] sm:$0xff]  ;;  %s2630_s19 = sshll.u32 %s273_s18, 4  ;;  %s2631_s19 = int_to_ptr.vmem [resolvable:$true] %s2630_s19 }
  0x1b   : > { %v282_v5 = vld [vmem:[%s278_s22 + $0x8] sm:$0xff]  ;;  %v284_v6 = vld [vmem:[%s278_s22 + $0x18] sm:$0xff]  ;;  %v281_v7 = vld [vmem:[%s278_s22] sm:$0xff]  ;;  %s2616_s23 = scalar_lea.sflag [#allocation4], %s271_s15  ;;  %s2850_s24 = scalar_lea.vmem %s2631_s19, 128 }
  0x1c   : > { %480 = vmatprep.subr.mxu0 %v282_v5  ;;  %641 = vmatprep.subr.mxu1 %v284_v6  ;;  %v283_v8 = vld [vmem:[%s278_s22 + $0x10] sm:$0xff]  ;;  %v286_v9 = vld [vmem:[%s278_s22 + $0x28] sm:$0xff]  ;;  %v288_v10 = vld [vmem:[%s278_s22 + $0x38] sm:$0xff]  ;;  %p2851_p11 = scmp.ne.s32.totalorder %s2631_s19, %s2850_s24  ;;  %s2915_s6 = smov [#allocation3]  }
  0x1d   : > { %481 = vmatpush1.msra.mxu0 %v281_v7  ;;  %642 = vmatpush1.msra.mxu1 %v283_v8  ;;  %v285_v11 = vld [vmem:[%s278_s22 + $0x20] sm:$0xff]  ;;  %v287_v12 = vld [vmem:[%s278_s22 + $0x30] sm:$0xff]  ;;  %v310_v26 = vld [vmem:[%s4481_s2 + $0x28] sm:$0xff]  ;;  %s2628_s22 = scalar_lea.hbm %s4486_s7, %s2773_s17  ;;  %s2854_s25 = sshll.u32 %s2915_s6, 4  ;;  %s2855_s25 = int_to_ptr.vmem [resolvable:$false] %s2854_s25 }
  0x1e   : > { %2696 = vmatmul.mubr.msk.f32.vlgmr.msra.gmra.mxu0 %vm401_vm0, %v3022_v4  ;;  %2712 = vmatmul.mubr.msk.f32.vlgmr.msra.gmra.mxu1 %vm401_vm0, %v3022_v4  ;;  %v308_v29 = vld [vmem:[%s4481_s2 + $0x18] sm:$0xff]  ;;  %v307_v30 = vld [vmem:[%s4481_s2 + $0x10] sm:$0xff]  ;;  %v306_v32 = vld [vmem:[%s4481_s2 + $0x8] sm:$0xff]  ;;  %p2852_p12 = pnand %p2851_p11, %p2997_p5  ;;  %s2856_s30 = scalar_lea.vmem %s2855_s25, 256 }
  0x1f   : > { %520 = vmatprep.mubr.f32.mxu0 %v4487_v0  ;;  %681 = vmatprep.mubr.f32.mxu1 %v4487_v0  ;;  %v3135_v31 = vld [vmem:[%s4480_s1 + $0x38] sm:$0xff]  ;;  %v305_v33 = vld [vmem:[%s4481_s2] sm:$0xff]  ;;  %v1239_v36 = vld [vmem:[%s4483_s4 + $0x8] sm:$0xff]  ;;  %p2857_p0 = scmp.lt.s32.totalorder %s2631_s19, %s2855_s25  ;;  %p2858_p1 = scmp.lt.s32.totalorder %s2856_s30, %s2850_s24 }
  0x20   : > { %802 = vmatprep.subr.mxu0 %v286_v9  ;;  %963 = vmatprep.subr.mxu1 %v288_v10  ;;  %v3152_v34 = vld [vmem:[%s4480_s1 + $0x40] sm:$0xff]  ;;  %v3169_v37 = vld [vmem:[%s4480_s1 + $0x48] sm:$0xff]  ;;  %v1240_v38 = vld [vmem:[%s4483_s4 + $0x10] sm:$0xff]  ;;  %p2853_p13 = pneg %p2852_p12 }
  0x21   : > { %803 = vmatpush1.msra.mxu0 %v285_v11  ;;  %964 = vmatpush1.msra.mxu1 %v287_v12  ;;  %v1238_v35 = vld [vmem:[%s4483_s4] sm:$0xff]  ;;  %v1241_v39 = vld [vmem:[%s4483_s4 + $0x18] sm:$0xff]  ;;  %v3186_v40 = vld [vmem:[%s4480_s1 + $0x50] sm:$0xff]  ;;  %p2859_p2 = por %p2858_p1, %p2857_p0 }
  0x22   : > { %2697 = vmatmul.mubr.msk.f32.gmra.mxu0 %vm401_vm0, %v3033_v13  ;;  %2713 = vmatmul.mubr.msk.f32.gmra.mxu1 %vm401_vm0, %v3033_v13  ;;  %v2106_v41 = vld [vmem:[%s4484_s5] sm:$0xff]  ;;  %v2107_v42 = vld [vmem:[%s4484_s5 + $0x8] sm:$0xff]  ;;  %v3203_v43 = vld [vmem:[%s4480_s1 + $0x58] sm:$0xff] }
  0x23   : > { %526 = vmatprep.mubr.f32.mxu0 %v4487_v0  ;;  %687 = vmatprep.mubr.f32.mxu1 %v4487_v0  ;;  %v1242_v44 = vld [vmem:[%s4483_s4 + $0x20] sm:$0xff]  ;;  %v2108_v45 = vld [vmem:[%s4484_s5 + $0x10] sm:$0xff]  ;;  %v1243_v47 = vld [vmem:[%s4483_s4 + $0x28] sm:$0xff]  ;;  %p2860_p3 = pnand %p2859_p2, %p2853_p13 }
  0x24   : > { %393 = vperm.xlu0 %2816, %v319_v14   ;;  %383 = vperm.xlu1 %2817, %v317_v15   ;;  %v3220_v46 = vld [vmem:[%s4480_s1 + $0x60] sm:$0xff]  ;;  %v2109_v48 = vld [vmem:[%s4484_s5 + $0x18] sm:$0xff]  ;;  %v3237_v49 = vld [vmem:[%s4480_s1 + $0x68] sm:$0xff] }
  0x25   : > { %v1244_v50 = vld [vmem:[%s4483_s4 + $0x30] sm:$0xff]  ;;  %v2110_v51 = vld [vmem:[%s4484_s5 + $0x20] sm:$0xff]  ;;  %v1245_v53 = vld [vmem:[%s4483_s4 + $0x38] sm:$0xff] }
  0x26   : > { %2698 = vmatmul.mubr.msk.f32.gmra.mxu0 %vm401_vm0, %v3050_v16  ;;  %2714 = vmatmul.mubr.msk.f32.gmra.mxu1 %vm401_vm0, %v3050_v16  ;;  %v3254_v52 = vld [vmem:[%s4480_s1 + $0x70] sm:$0xff]  ;;  %v2111_v54 = vld [vmem:[%s4484_s5 + $0x28] sm:$0xff]  ;;  %v3271_v55 = vld [vmem:[%s4480_s1 + $0x78] sm:$0xff] }
  0x27   : > { %532 = vmatprep.mubr.f32.mxu0 %v4487_v0  ;;  %693 = vmatprep.mubr.f32.mxu1 %v4487_v0  ;;  %v1246_v56 = vld [vmem:[%s4483_s4 + $0x40] sm:$0xff]  ;;  %v2112_v57 = vld [vmem:[%s4484_s5 + $0x30] sm:$0xff]  ;;  %v1247_v58 = vld [vmem:[%s4483_s4 + $0x48] sm:$0xff] }
  0x28   : > { %378 = vperm.xlu0 %2816, %v316_v17   ;;  %373 = vperm.xlu1 %2817, %v315_v18   ;;  %v2113_v59 = vld [vmem:[%s4484_s5 + $0x38] sm:$0xff]  ;;  %v1248_v60 = vld [vmem:[%s4483_s4 + $0x50] sm:$0xff]  ;;  %v2114_v61 = vld [vmem:[%s4484_s5 + $0x40] sm:$0xff] }
  0x29   : > { %v1249_v62 = vld [vmem:[%s4483_s4 + $0x58] sm:$0xff]  ;;  %v2115_v63 = vld [vmem:[%s4484_s5 + $0x48] sm:$0xff]  ;;  %v1250_v1 = vld [vmem:[%s4483_s4 + $0x60] sm:$0xff] }
  0x2a   : > { %2699 = vmatmul.mubr.msk.f32.gmra.mxu0 %vm401_vm0, %v3067_v19  ;;  %2715 = vmatmul.mubr.msk.f32.gmra.mxu1 %vm401_vm0, %v3067_v19  ;;  %v2116_v2 = vld [vmem:[%s4484_s5 + $0x50] sm:$0xff]  ;;  %v1251_v3 = vld [vmem:[%s4483_s4 + $0x68] sm:$0xff]  ;;  %v2118_v6 = vld [vmem:[%s4484_s5 + $0x60] sm:$0xff] }
  0x2b   : > { %538 = vmatprep.mubr.f32.mxu0 %v4487_v0  ;;  %699 = vmatprep.mubr.f32.mxu1 %v4487_v0  ;;  %v1252_v5 = vld [vmem:[%s4483_s4 + $0x70] sm:$0xff]  ;;  %v1253_v7 = vld [vmem:[%s4483_s4 + $0x78] sm:$0xff]  ;;  %v2119_v8 = vld [vmem:[%s4484_s5 + $0x68] sm:$0xff] }
  0x2c   : > { %368 = vperm.xlu0 %2816, %v314_v20   ;;  %363 = vperm.xlu1 %2817, %v313_v21   ;;  %v2120_v9 = vld [vmem:[%s4484_s5 + $0x70] sm:$0xff]  ;;  %v2121_v10 = vld [vmem:[%s4484_s5 + $0x78] sm:$0xff] }
  0x2e   : > { %2700 = vmatmul.mubr.msk.f32.gmra.mxu0 %vm401_vm0, %v3084_v22  ;;  %2716 = vmatmul.mubr.msk.f32.gmra.mxu1 %vm401_vm0, %v3084_v22 }
  0x2f   : > { %544 = vmatprep.mubr.f32.mxu0 %v4487_v0  ;;  %705 = vmatprep.mubr.f32.mxu1 %v4487_v0 }
  0x30   : > { %358 = vperm.xlu0 %2816, %v312_v23   ;;  %353 = vperm.xlu1 %2817, %v311_v24  }
  0x32   : > { %2701 = vmatmul.mubr.msk.f32.gmra.mxu0 %vm401_vm0, %v3101_v25  ;;  %2717 = vmatmul.mubr.msk.f32.gmra.mxu1 %vm401_vm0, %v3101_v25 }
  0x33   : > { %550 = vmatprep.mubr.f32.mxu0 %v4487_v0  ;;  %711 = vmatprep.mubr.f32.mxu1 %v4487_v0 }
  0x34   : > { %348 = vperm.xlu0 %2816, %v310_v26   ;;  %343 = vperm.xlu1 %2817, %v309_v27  }
  0x36   : > { %2702 = vmatmul.mubr.msk.f32.gmra.mxu0 %vm401_vm0, %v3118_v28  ;;  %2718 = vmatmul.mubr.msk.f32.gmra.mxu1 %vm401_vm0, %v3118_v28 }
  0x37   : > { %556 = vmatprep.mubr.f32.mxu0 %v4487_v0  ;;  %717 = vmatprep.mubr.f32.mxu1 %v4487_v0 }
  0x38   : > { %338 = vperm.xlu0 %2816, %v308_v29   ;;  %333 = vperm.xlu1 %2817, %v307_v30  }
  0x3a   : > { %2703 = vmatmul.mubr.msk.f32.gmra.mxu0 %vm401_vm0, %v3135_v31  ;;  %2719 = vmatmul.mubr.msk.f32.gmra.mxu1 %vm401_vm0, %v3135_v31 }
  0x3b   : > { %562 = vmatprep.mubr.f32.mxu0 %v4487_v0  ;;  %723 = vmatprep.mubr.f32.mxu1 %v4487_v0 }
  0x3c   : > { %328 = vperm.xlu0 %2816, %v306_v32   ;;  %323 = vperm.xlu1 %2817, %v305_v33  }
  0x3e   : > { %2704 = vmatmul.mubr.msk.f32.gmra.mxu0 %vm401_vm0, %v3152_v34  ;;  %2720 = vmatmul.mubr.msk.f32.gmra.mxu1 %vm401_vm0, %v3152_v34 }
  0x3f   : > { %568 = vmatprep.mubr.f32.mxu0 %v4487_v0  ;;  %729 = vmatprep.mubr.f32.mxu1 %v4487_v0 }
  0x40   : > { %1256 = vperm.xlu0 %2816, %v1238_v35   ;;  %1261 = vperm.xlu1 %2817, %v1239_v36  }
  0x42   : > { %2705 = vmatmul.mubr.msk.f32.gmra.mxu0 %vm401_vm0, %v3169_v37  ;;  %2721 = vmatmul.mubr.msk.f32.gmra.mxu1 %vm401_vm0, %v3169_v37 }
  0x43   : > { %574 = vmatprep.mubr.f32.mxu0 %v4487_v0  ;;  %735 = vmatprep.mubr.f32.mxu1 %v4487_v0 }
  0x44   : > { %1266 = vperm.xlu0 %2816, %v1240_v38   ;;  %1271 = vperm.xlu1 %2817, %v1241_v39  }
  0x46   : > { %2706 = vmatmul.mubr.msk.f32.gmra.mxu0 %vm401_vm0, %v3186_v40  ;;  %2722 = vmatmul.mubr.msk.f32.gmra.mxu1 %vm401_vm0, %v3186_v40 }
  0x47   : > { %580 = vmatprep.mubr.f32.mxu0 %v4487_v0  ;;  %741 = vmatprep.mubr.f32.mxu1 %v4487_v0 }
  0x48   : > { %2124 = vperm.xlu0 %2816, %v2106_v41   ;;  %2129 = vperm.xlu1 %2817, %v2107_v42  }
  0x4a   : > { %2707 = vmatmul.mubr.msk.f32.gmra.mxu0 %vm401_vm0, %v3203_v43  ;;  %2723 = vmatmul.mubr.msk.f32.gmra.mxu1 %vm401_vm0, %v3203_v43 }
  0x4b   : > { %586 = vmatprep.mubr.f32.mxu0 %v4487_v0  ;;  %747 = vmatprep.mubr.f32.mxu1 %v4487_v0 }
  0x4c   : > { %1276 = vperm.xlu0 %2816, %v1242_v44   ;;  %2134 = vperm.xlu1 %2817, %v2108_v45  }
  0x4e   : > { %2708 = vmatmul.mubr.msk.f32.gmra.mxu0 %vm401_vm0, %v3220_v46  ;;  %2724 = vmatmul.mubr.msk.f32.gmra.mxu1 %vm401_vm0, %v3220_v46 }
  0x4f   : > { %592 = vmatprep.mubr.f32.mxu0 %v4487_v0  ;;  %753 = vmatprep.mubr.f32.mxu1 %v4487_v0 }
  0x50   : > { %1281 = vperm.xlu0 %2816, %v1243_v47   ;;  %2139 = vperm.xlu1 %2817, %v2109_v48  }
  0x52   : > { %2709 = vmatmul.mubr.msk.f32.gmra.mxu0 %vm401_vm0, %v3237_v49  ;;  %2725 = vmatmul.mubr.msk.f32.gmra.mxu1 %vm401_vm0, %v3237_v49 }
  0x53   : > { %598 = vmatprep.mubr.f32.mxu0 %v4487_v0  ;;  %759 = vmatprep.mubr.f32.mxu1 %v4487_v0 }
  0x54   : > { %1286 = vperm.xlu0 %2816, %v1244_v50   ;;  %2144 = vperm.xlu1 %2817, %v2110_v51  }
  0x56   : > { %2710 = vmatmul.mubr.msk.f32.gmra.mxu0 %vm401_vm0, %v3254_v52  ;;  %2726 = vmatmul.mubr.msk.f32.gmra.mxu1 %vm401_vm0, %v3254_v52 }
  0x57   : > { %604 = vmatprep.mubr.f32.mxu0 %v4487_v0  ;;  %765 = vmatprep.mubr.f32.mxu1 %v4487_v0 }
  0x58   : > { %1291 = vperm.xlu0 %2816, %v1245_v53   ;;  %2149 = vperm.xlu1 %2817, %v2111_v54  }
  0x5a   : > { %2711 = vmatmul.mubr.msk.f32.gmra.mxu0 %vm401_vm0, %v3271_v55  ;;  %2727 = vmatmul.mubr.msk.f32.gmra.mxu1 %vm401_vm0, %v3271_v55 }
  0x5b   : > { %836 = vmatprep.mubr.f32.mxu0 %v4487_v0  ;;  %997 = vmatprep.mubr.f32.mxu1 %v4487_v0 }
  0x5c   : > { %1296 = vperm.xlu0 %2816, %v1246_v56   ;;  %2154 = vperm.xlu1 %2817, %v2112_v57  }
  0x5e   : > { %2728 = vmatmul.mubr.msk.f32.vlgmr.msra.gmra.mxu0 %vm401_vm0, %v3022_v4  ;;  %2744 = vmatmul.mubr.msk.f32.vlgmr.msra.gmra.mxu1 %vm401_vm0, %v3022_v4  ;;  %v2117_v4 = vld [vmem:[%s4484_s5 + $0x58] sm:$0xff] }
  0x5f   : > { %842 = vmatprep.mubr.f32.mxu0 %v4487_v0  ;;  %1003 = vmatprep.mubr.f32.mxu1 %v4487_v0 }
  0x60   : > { %1301 = vperm.xlu0 %2816, %v1247_v58   ;;  %2159 = vperm.xlu1 %2817, %v2113_v59  }
  0x62   : > { %2729 = vmatmul.mubr.msk.f32.gmra.mxu0 %vm401_vm0, %v3033_v13  ;;  %2745 = vmatmul.mubr.msk.f32.gmra.mxu1 %vm401_vm0, %v3033_v13 }
  0x63   : > { %848 = vmatprep.mubr.f32.mxu0 %v4487_v0  ;;  %1009 = vmatprep.mubr.f32.mxu1 %v4487_v0 }
  0x64   : > { %1306 = vperm.xlu0 %2816, %v1248_v60   ;;  %2164 = vperm.xlu1 %2817, %v2114_v61  }
  0x66   : > { %2730 = vmatmul.mubr.msk.f32.gmra.mxu0 %vm401_vm0, %v3050_v16  ;;  %2746 = vmatmul.mubr.msk.f32.gmra.mxu1 %vm401_vm0, %v3050_v16 }
  0x67   : > { %854 = vmatprep.mubr.f32.mxu0 %v4487_v0  ;;  %1015 = vmatprep.mubr.f32.mxu1 %v4487_v0 }
  0x68   : > { %1311 = vperm.xlu0 %2816, %v1249_v62   ;;  %2169 = vperm.xlu1 %2817, %v2115_v63  }
  0x6a   : > { %2731 = vmatmul.mubr.msk.f32.gmra.mxu0 %vm401_vm0, %v3067_v19  ;;  %2747 = vmatmul.mubr.msk.f32.gmra.mxu1 %vm401_vm0, %v3067_v19 }
  0x6b   : > { %860 = vmatprep.mubr.f32.mxu0 %v4487_v0  ;;  %1021 = vmatprep.mubr.f32.mxu1 %v4487_v0 }
  0x6c   : > { %1316 = vperm.xlu0 %2816, %v1250_v1   ;;  %2174 = vperm.xlu1 %2817, %v2116_v2  }
  0x6e   : > { %2732 = vmatmul.mubr.msk.f32.gmra.mxu0 %vm401_vm0, %v3084_v22  ;;  %2748 = vmatmul.mubr.msk.f32.gmra.mxu1 %vm401_vm0, %v3084_v22 }
  0x6f   : > { %866 = vmatprep.mubr.f32.mxu0 %v4487_v0  ;;  %1027 = vmatprep.mubr.f32.mxu1 %v4487_v0 }
  0x70   : > { %1321 = vperm.xlu0 %2816, %v1251_v3   ;;  %2179 = vperm.xlu1 %2817, %v2117_v4  }
  0x72   : > { %2733 = vmatmul.mubr.msk.f32.gmra.mxu0 %vm401_vm0, %v3101_v25  ;;  %2749 = vmatmul.mubr.msk.f32.gmra.mxu1 %vm401_vm0, %v3101_v25 }
  0x73   : > { %872 = vmatprep.mubr.f32.mxu0 %v4487_v0  ;;  %1033 = vmatprep.mubr.f32.mxu1 %v4487_v0 }
  0x74   : > { %1326 = vperm.xlu0 %2816, %v1252_v5   ;;  %2184 = vperm.xlu1 %2817, %v2118_v6  }
  0x76   : > { %2734 = vmatmul.mubr.msk.f32.gmra.mxu0 %vm401_vm0, %v3118_v28  ;;  %2750 = vmatmul.mubr.msk.f32.gmra.mxu1 %vm401_vm0, %v3118_v28 }
  0x77   : > { %878 = vmatprep.mubr.f32.mxu0 %v4487_v0  ;;  %1039 = vmatprep.mubr.f32.mxu1 %v4487_v0 }
  0x78   : > { %1331 = vperm.xlu0 %2816, %v1253_v7   ;;  %2189 = vperm.xlu1 %2817, %v2119_v8  }
  0x7a   : > { %2735 = vmatmul.mubr.msk.f32.gmra.mxu0 %vm401_vm0, %v3135_v31  ;;  %2751 = vmatmul.mubr.msk.f32.gmra.mxu1 %vm401_vm0, %v3135_v31 }
  0x7b   : > { %884 = vmatprep.mubr.f32.mxu0 %v4487_v0  ;;  %1045 = vmatprep.mubr.f32.mxu1 %v4487_v0 }
  0x7c   : > { %2194 = vperm.xlu0 %2816, %v2120_v9   ;;  %2199 = vperm.xlu1 %2817, %v2121_v10  }
  0x7e   : > { %2736 = vmatmul.mubr.msk.f32.gmra.mxu0 %vm401_vm0, %v3152_v34  ;;  %2752 = vmatmul.mubr.msk.f32.gmra.mxu1 %vm401_vm0, %v3152_v34 }
  0x7f   : > { %890 = vmatprep.mubr.f32.mxu0 %v4487_v0  ;;  %1051 = vmatprep.mubr.f32.mxu1 %v4487_v0 }
  0x82   : > { %2737 = vmatmul.mubr.msk.f32.gmra.mxu0 %vm401_vm0, %v3169_v37  ;;  %2753 = vmatmul.mubr.msk.f32.gmra.mxu1 %vm401_vm0, %v3169_v37 }
  0x83   : > { %896 = vmatprep.mubr.f32.mxu0 %v4487_v0  ;;  %1057 = vmatprep.mubr.f32.mxu1 %v4487_v0 }
  0x86   : > { %2738 = vmatmul.mubr.msk.f32.gmra.mxu0 %vm401_vm0, %v3186_v40  ;;  %2754 = vmatmul.mubr.msk.f32.gmra.mxu1 %vm401_vm0, %v3186_v40 }
  0x87   : > { %902 = vmatprep.mubr.f32.mxu0 %v4487_v0  ;;  %1063 = vmatprep.mubr.f32.mxu1 %v4487_v0 }
  0x8a   : > { %2739 = vmatmul.mubr.msk.f32.gmra.mxu0 %vm401_vm0, %v3203_v43  ;;  %2755 = vmatmul.mubr.msk.f32.gmra.mxu1 %vm401_vm0, %v3203_v43 }
  0x8b   : > { %908 = vmatprep.mubr.f32.mxu0 %v4487_v0  ;;  %1069 = vmatprep.mubr.f32.mxu1 %v4487_v0 }
  0x8e   : > { %2740 = vmatmul.mubr.msk.f32.gmra.mxu0 %vm401_vm0, %v3220_v46  ;;  %2756 = vmatmul.mubr.msk.f32.gmra.mxu1 %vm401_vm0, %v3220_v46 }
  0x8f   : > { %914 = vmatprep.mubr.f32.mxu0 %v4487_v0  ;;  %1075 = vmatprep.mubr.f32.mxu1 %v4487_v0 }
  0x92   : > { %2741 = vmatmul.mubr.msk.f32.gmra.mxu0 %vm401_vm0, %v3237_v49  ;;  %2757 = vmatmul.mubr.msk.f32.gmra.mxu1 %vm401_vm0, %v3237_v49 }
  0x93   : > { %920 = vmatprep.mubr.f32.mxu0 %v4487_v0  ;;  %1081 = vmatprep.mubr.f32.mxu1 %v4487_v0  ;;  %v3521_v57 = vpop.permute.xlu0 %398  ;;  %v3523_v60 = vpop.permute.xlu1 %388 }
  0x94   : > { %4545 = vst [vmem:[#allocation25_spill] sm:$0xff] %v3521_v57 }
  0x96   : > { %2742 = vmatmul.mubr.msk.f32.gmra.mxu0 %vm401_vm0, %v3254_v52  ;;  %2758 = vmatmul.mubr.msk.f32.gmra.mxu1 %vm401_vm0, %v3254_v52 }
  0x97   : > { %926 = vmatprep.mubr.f32.mxu0 %v4487_v0  ;;  %1087 = vmatprep.mubr.f32.mxu1 %v4487_v0 }
  0x9a   : > { %2743 = vmatmul.mubr.msk.f32.gmra.mxu0 %vm401_vm0, %v3271_v55  ;;  %2759 = vmatmul.mubr.msk.f32.gmra.mxu1 %vm401_vm0, %v3271_v55 }
  0x9b   : > { %1398 = vmatprep.mubr.f32.mxu0 %v4487_v0  ;;  %1559 = vmatprep.mubr.f32.mxu1 %v4487_v0 }
  0x9f   : > { %v3525_v2 = vpop.permute.xlu0 %393  ;;  %v3527_v5 = vpop.permute.xlu1 %383 }
  0xa0   : > { %4546 = vst [vmem:[#allocation26_spill] sm:$0xff] %v3525_v2 }
  0xa3   : > { %v3529_v10 = vpop.permute.xlu0 %378 }
  0xde   : > { %v3429_v11 = vpop.f32.mrf.mxu0  ;;  %v3431_v12 = vpop.f32.mrf.mxu1 }
  0xdf   : > { %4526 = vst [vmem:[#allocation6_spill] sm:$0xff] %v3429_v11  ;;  %4527 = vst [vmem:[#allocation7_spill] sm:$0xff] %v3431_v12  ;;  %v3531_v11 = vpop.permute.xlu1 %373 }
  0xe0   : > { %v3433_v13 = vpop.f32.mrf.mxu0  ;;  %v3435_v14 = vpop.f32.mrf.mxu1 }
  0xe1   : > { %4528 = vst [vmem:[#allocation8_spill] sm:$0xff] %v3433_v13  ;;  %4529 = vst [vmem:[#allocation9_spill] sm:$0xff] %v3435_v14 }
  0xe2   : > { %v3437_v15 = vpop.f32.mrf.mxu0  ;;  %v3439_v16 = vpop.f32.mrf.mxu1 }
  0xe3   : > { %4530 = vst [vmem:[#allocation10_spill] sm:$0xff] %v3437_v15  ;;  %4531 = vst [vmem:[#allocation11_spill] sm:$0xff] %v3439_v16 }
  0xe4   : > { %v3441_v17 = vpop.f32.mrf.mxu0  ;;  %v3443_v18 = vpop.f32.mrf.mxu1 }
  0xe5   : > { %4532 = vst [vmem:[#allocation12_spill] sm:$0xff] %v3441_v17  ;;  %4533 = vst [vmem:[#allocation13_spill] sm:$0xff] %v3443_v18 }
  0xe6   : > { %v3445_v19 = vpop.f32.mrf.mxu0  ;;  %v3447_v20 = vpop.f32.mrf.mxu1 }
  0xe7   : > { %4534 = vst [vmem:[#allocation14_spill] sm:$0xff] %v3445_v19  ;;  %4535 = vst [vmem:[#allocation15_spill] sm:$0xff] %v3447_v20  ;;  %v3535_v20 = vpop.permute.xlu0 %368 }
  0xe8   : > { %v3449_v21 = vpop.f32.mrf.mxu0  ;;  %v3451_v22 = vpop.f32.mrf.mxu1 }
  0xe9   : > { %4536 = vst [vmem:[#allocation16_spill] sm:$0xff] %v3449_v21  ;;  %4537 = vst [vmem:[#allocation17_spill] sm:$0xff] %v3451_v22 }
  0xea   : > { %v3453_v23 = vpop.f32.mrf.mxu0  ;;  %v3455_v24 = vpop.f32.mrf.mxu1 }
  0xeb   : > { %4538 = vst [vmem:[#allocation18_spill] sm:$0xff] %v3453_v23  ;;  %4539 = vst [vmem:[#allocation19_spill] sm:$0xff] %v3455_v24 }
  0xec   : > { %v3457_v25 = vpop.f32.mrf.mxu0  ;;  %v3459_v26 = vpop.f32.mrf.mxu1 }
  0xed   : > { %4540 = vst [vmem:[#allocation20_spill] sm:$0xff] %v3457_v25  ;;  %4541 = vst [vmem:[#allocation21_spill] sm:$0xff] %v3459_v26 }
  0xee   : > { %v3461_v27 = vpop.f32.mrf.mxu0  ;;  %v3463_v28 = vpop.f32.mrf.mxu1 }
  0xef   : > { %4542 = vst [vmem:[#allocation22_spill] sm:$0xff] %v3461_v27  ;;  %4543 = vst [vmem:[#allocation23_spill] sm:$0xff] %v3463_v28 }
  0xf0   : > { %v3465_v29 = vpop.f32.mrf.mxu0  ;;  %v3467_v30 = vpop.f32.mrf.mxu1 }
  0xf1   : > { %4544 = vst [vmem:[#allocation24_spill] sm:$0xff] %v3467_v30 }
  0xf2   : > { %v3469_v31 = vpop.f32.mrf.mxu0  ;;  %v3471_v32 = vpop.f32.mrf.mxu1 }
  0xf4   : > { %v3473_v33 = vpop.f32.mrf.mxu0  ;;  %v3475_v34 = vpop.f32.mrf.mxu1 }
  0xf6   : > { %v3477_v35 = vpop.f32.mrf.mxu0  ;;  %v3479_v36 = vpop.f32.mrf.mxu1 }
  0xf8   : > { %v3481_v37 = vpop.f32.mrf.mxu0  ;;  %v3483_v38 = vpop.f32.mrf.mxu1 }
  0xfa   : > { %v3485_v39 = vpop.f32.mrf.mxu0  ;;  %v3487_v40 = vpop.f32.mrf.mxu1 }
  0xfc   : > { %v3489_v41 = vpop.f32.mrf.mxu0  ;;  %v3491_v42 = vpop.f32.mrf.mxu1 }
  0xfe   : > { %v3493_v43 = vpop.f32.mrf.mxu0  ;;  %v3495_v44 = vpop.f32.mrf.mxu1 }
 0x100   : > { %v3497_v45 = vpop.f32.mrf.mxu0  ;;  %v3499_v46 = vpop.f32.mrf.mxu1 }
 0x102   : > { %v3501_v47 = vpop.f32.mrf.mxu0  ;;  %v3503_v48 = vpop.f32.mrf.mxu1 }
 0x104   : > { %v3505_v49 = vpop.f32.mrf.mxu0  ;;  %v3507_v50 = vpop.f32.mrf.mxu1 }
 0x106   : > { %v3509_v51 = vpop.f32.mrf.mxu0  ;;  %v3511_v52 = vpop.f32.mrf.mxu1 }
 0x108   : > { %v3513_v53 = vpop.f32.mrf.mxu0  ;;  %v3515_v54 = vpop.f32.mrf.mxu1 }
 0x10a   : > { %v3517_v55 = vpop.f32.mrf.mxu0  ;;  %v3519_v56 = vpop.f32.mrf.mxu1 }
 0x10c   : > { %v584_v58 = vpop.f32.mrf.mxu0  ;;  %v745_v59 = vpop.f32.mrf.mxu1 }
 0x10e   : > { %v588_v61 = vpop.f32.mrf.mxu0  ;;  %v749_v62 = vpop.f32.mrf.mxu1 }
 0x110   : > { %v590_v63 = vpop.f32.mrf.mxu0  ;;  %v751_v1 = vpop.f32.mrf.mxu1 }
 0x112   : > { %v594_v3 = vpop.f32.mrf.mxu0  ;;  %v755_v4 = vpop.f32.mrf.mxu1 }
 0x114   : > { %v596_v6 = vpop.f32.mrf.mxu0  ;;  %v757_v7 = vpop.f32.mrf.mxu1 }
 0x115   : > { %v597_v28 = vadd.f32 %v596_v6, %v3523_v60 }
 0x116   : > { %v600_v8 = vpop.f32.mrf.mxu0  ;;  %v761_v9 = vpop.f32.mrf.mxu1 }
 0x117   : > { %v601_v23 = vadd.f32 %v600_v8, %v3525_v2  ;;  %v762_v26 = vadd.f32 %v761_v9, %v3525_v2 }
 0x118   : > { %v602_v0 = vpop.f32.mrf.mxu0  ;;  %v763_v12 = vpop.f32.mrf.mxu1 }
 0x119   : > { %v603_v19 = vadd.f32 %v602_v0, %v3525_v2  ;;  %v764_v22 = vadd.f32 %v763_v12, %v3525_v2  ;;  %v758_v0 = vadd.f32 %v757_v7, %v3523_v60  ;;  %v3565_v7 = vpop.permute.xlu0 %358 }
 0x11a   : > { %v606_v14 = vpop.f32.mrf.mxu0  ;;  %v767_v13 = vpop.f32.mrf.mxu1 }
 0x11b   : > { %v607_v16 = vadd.f32 %v606_v14, %v3521_v57  ;;  %v768_v15 = vadd.f32 %v767_v13, %v3521_v57  ;;  %v3547_v13 = vpop.permute.xlu1 %363  ;;  %v1207_v2 = vmax.f32 %v603_v19, 0.0  ;;  %v1209_v6 = vmax.f32 %v764_v22, 0.0 }
 0x11c   : > { %v608_v18 = vpop.f32.mrf.mxu0  ;;  %v769_v17 = vpop.f32.mrf.mxu1  ;;  %v746_v19 = vadd.f32 %v745_v59, %v3529_v10  ;;  %v1199_v22 = vmax.f32 %v597_v28, 0.0  ;;  %v579_v28 = vadd.f32 %v3513_v53, %v3531_v11  ;;  %v740_v59 = vadd.f32 %v3515_v54, %v3531_v11 }
 0x11d   : > { %v609_v21 = vadd.f32 %v608_v18, %v3521_v57  ;;  %v770_v24 = vadd.f32 %v769_v17, %v3521_v57  ;;  %v595_v18 = vadd.f32 %v594_v3, %v3523_v60  ;;  %v756_v17 = vadd.f32 %v755_v4, %v3523_v60 }
 0x11e   : > { %v3543_v25 = vpop.f32.mrf.mxu0  ;;  %v3545_v14 = vpop.f32.mrf.mxu1  ;;  %v1214_v57 = vmax.f32 %v607_v16, 0.0  ;;  %v1216_v8 = vmax.f32 %v768_v15, 0.0  ;;  %v1206_v3 = vmax.f32 %v601_v23, 0.0  ;;  %v1208_v4 = vmax.f32 %v762_v26, 0.0 }
 0x11f   : > { %4547 = vst [vmem:[#allocation27_spill] sm:$0xff] %v3543_v25  ;;  %4548 = vst [vmem:[#allocation28_spill] sm:$0xff] %v3545_v14  ;;  %v1215_v27 = vmax.f32 %v609_v21, 0.0  ;;  %v1217_v12 = vmax.f32 %v770_v24, 0.0  ;;  %v591_v14 = vadd.f32 %v590_v63, %v3527_v5  ;;  %v752_v25 = vadd.f32 %v751_v1, %v3527_v5 }
 0x120   : > { %v3553_v30 = vpop.f32.mrf.mxu0  ;;  %v3555_v9 = vpop.f32.mrf.mxu1  ;;  %v589_v21 = vadd.f32 %v588_v61, %v3527_v5  ;;  %v750_v24 = vadd.f32 %v749_v62, %v3527_v5  ;;  %v585_v63 = vadd.f32 %v584_v58, %v3529_v10  ;;  %v583_v23 = vadd.f32 %v3517_v55, %v3529_v10 }
 0x121   : > { %4549 = vst [vmem:[#allocation29_spill] sm:$0xff] %v3553_v30  ;;  %4550 = vst [vmem:[#allocation30_spill] sm:$0xff] %v3555_v9  ;;  %1334 = vmatprep.subr.mxu0 %v1215_v27  ;;  %1495 = vmatprep.subr.mxu1 %v1217_v12  ;;  %v1201_v27 = vmax.f32 %v758_v0, 0.0  ;;  %v744_v26 = vadd.f32 %v3519_v56, %v3529_v10  ;;  %v1198_v61 = vmax.f32 %v595_v18, 0.0  ;;  %v1200_v62 = vmax.f32 %v756_v17, 0.0  ;;  %v3577_v58 = vpop.permute.xlu1 %353 }
 0x122   : > { %v3561_v16 = vpop.f32.mrf.mxu0  ;;  %v3563_v15 = vpop.f32.mrf.mxu1  ;;  %1335 = vmatpush1.msra.mxu0 %v1214_v57  ;;  %1496 = vmatpush1.msra.mxu1 %v1216_v8  ;;  %v1191_v55 = vmax.f32 %v591_v14, 0.0  ;;  %v577_v56 = vadd.f32 %v3509_v51, %v3531_v11  ;;  %v738_v0 = vadd.f32 %v3511_v52, %v3531_v11  ;;  %v1190_v12 = vmax.f32 %v589_v21, 0.0 }
 0x123   : > { %4551 = vst [vmem:[#allocation31_spill] sm:$0xff] %v3561_v16  ;;  %4552 = vst [vmem:[#allocation32_spill] sm:$0xff] %v3563_v15  ;;  %1336 = vmatprep.subr.mxu0 %v1207_v2  ;;  %1497 = vmatprep.subr.mxu1 %v1209_v6  ;;  %v1193_v2 = vmax.f32 %v752_v25, 0.0  ;;  %v1192_v18 = vmax.f32 %v750_v24, 0.0  ;;  %v573_v53 = vadd.f32 %v3505_v49, %v3535_v20  ;;  %v1183_v54 = vmax.f32 %v585_v63, 0.0  ;;  %v3603_v49 = vpop.permute.xlu0 %348  ;;  %v3811_v16 = vld [vmem:[%s4482_s3 + $0x28] sm:$0xff] }
 0x124   : > { %v3573_v57 = vpop.f32.mrf.mxu0  ;;  %v3575_v1 = vpop.f32.mrf.mxu1  ;;  %1337 = vmatpush1.msra.mxu0 %v1206_v3  ;;  %1498 = vmatpush1.msra.mxu1 %v1208_v4  ;;  %v734_v25 = vadd.f32 %v3507_v50, %v3535_v20  ;;  %v1185_v14 = vmax.f32 %v746_v19, 0.0  ;;  %v571_v51 = vadd.f32 %v3501_v47, %v3535_v20  ;;  %v732_v52 = vadd.f32 %v3503_v48, %v3535_v20 }
 0x125   : > { %4553 = vst [vmem:[#allocation33_spill] sm:$0xff] %v3573_v57  ;;  %4554 = vst [vmem:[#allocation34_spill] sm:$0xff] %v3575_v1  ;;  %1338 = vmatprep.subr.mxu0 %v1199_v22  ;;  %1499 = vmatprep.subr.mxu1 %v1201_v27  ;;  %v1182_v6 = vmax.f32 %v583_v23, 0.0  ;;  %v1184_v21 = vmax.f32 %v744_v26, 0.0  ;;  %v567_v50 = vadd.f32 %v3497_v45, %v3547_v13  ;;  %v1175_v47 = vmax.f32 %v579_v28, 0.0  ;;  %v3617_v45 = vpop.permute.xlu1 %343 }
 0x126   : > { %v3587_v17 = vpop.f32.mrf.mxu0  ;;  %v3589_v8 = vpop.f32.mrf.mxu1  ;;  %1339 = vmatpush1.msra.mxu0 %v1198_v61  ;;  %1500 = vmatpush1.msra.mxu1 %v1200_v62  ;;  %v728_v4 = vadd.f32 %v3499_v46, %v3547_v13  ;;  %v1177_v63 = vmax.f32 %v740_v59, 0.0  ;;  %v565_v48 = vadd.f32 %v3493_v43, %v3547_v13  ;;  %v726_v19 = vadd.f32 %v3495_v44, %v3547_v13 }
 0x127   : > { %4555 = vst [vmem:[#allocation35_spill] sm:$0xff] %v3587_v17  ;;  %4556 = vst [vmem:[#allocation36_spill] sm:$0xff] %v3589_v8  ;;  %1340 = vmatprep.subr.mxu0 %v1191_v55  ;;  %1501 = vmatprep.subr.mxu1 %v1193_v2  ;;  %v1174_v22 = vmax.f32 %v577_v56, 0.0  ;;  %v1176_v27 = vmax.f32 %v738_v0, 0.0  ;;  %v561_v46 = vadd.f32 %v3489_v41, %v3565_v7  ;;  %v1167_v43 = vmax.f32 %v573_v53, 0.0 }
 0x128   : > { %v3599_v24 = vpop.f32.mrf.mxu0  ;;  %v3601_v3 = vpop.f32.mrf.mxu1  ;;  %1341 = vmatpush1.msra.mxu0 %v1190_v12  ;;  %1502 = vmatpush1.msra.mxu1 %v1192_v18  ;;  %4561 = vst [vmem:[#allocation41_spill] sm:$0xff] %v3617_v45  ;;  %v722_v61 = vadd.f32 %v3491_v42, %v3565_v7  ;;  %v1169_v62 = vmax.f32 %v734_v25, 0.0  ;;  %v559_v44 = vadd.f32 %v3485_v39, %v3565_v7  ;;  %v1166_v59 = vmax.f32 %v571_v51, 0.0 }
 0x129   : > { %4557 = vst [vmem:[#allocation37_spill] sm:$0xff] %v3599_v24  ;;  %4558 = vst [vmem:[#allocation38_spill] sm:$0xff] %v3601_v3  ;;  %1342 = vmatprep.subr.mxu0 %v1183_v54  ;;  %1503 = vmatprep.subr.mxu1 %v1185_v14  ;;  %v720_v28 = vadd.f32 %v3487_v40, %v3565_v7  ;;  %v1168_v55 = vmax.f32 %v732_v52, 0.0  ;;  %v555_v41 = vadd.f32 %v3481_v37, %v3577_v58  ;;  %v3643_v37 = vpop.permute.xlu0 %338 }
 0x12a   : > { %v3613_v23 = vpop.f32.mrf.mxu0  ;;  %v3615_v26 = vpop.f32.mrf.mxu1  ;;  %1343 = vmatpush1.msra.mxu0 %v1182_v6  ;;  %1504 = vmatpush1.msra.mxu1 %v1184_v21  ;;  %v716_v42 = vadd.f32 %v3483_v38, %v3577_v58  ;;  %v1159_v0 = vmax.f32 %v567_v50, 0.0  ;;  %v1161_v12 = vmax.f32 %v728_v4, 0.0  ;;  %v553_v39 = vadd.f32 %v3477_v35, %v3577_v58  ;;  %4566 = vst [vmem:[#allocation46_spill] sm:$0xff] %v3643_v37 }
 0x12b   : > { %4559 = vst [vmem:[#allocation39_spill] sm:$0xff] %v3613_v23  ;;  %4560 = vst [vmem:[#allocation40_spill] sm:$0xff] %v3615_v26  ;;  %1344 = vmatprep.subr.mxu0 %v1175_v47  ;;  %1505 = vmatprep.subr.mxu1 %v1177_v63  ;;  %v714_v40 = vadd.f32 %v3479_v36, %v3577_v58  ;;  %v1158_v18 = vmax.f32 %v565_v48, 0.0  ;;  %v1160_v53 = vmax.f32 %v726_v19, 0.0  ;;  %v1151_v35 = vmax.f32 %v561_v46, 0.0  ;;  %v4570_v47 = vld [vmem:[#allocation24_spill] sm:$0xff] }
 0x12c   : > { %v3627_v2 = vpop.f32.mrf.mxu0  ;;  %v3629_v56 = vpop.f32.mrf.mxu1  ;;  %1345 = vmatpush1.msra.mxu0 %v1174_v22  ;;  %1506 = vmatpush1.msra.mxu1 %v1176_v27  ;;  %v549_v38 = vadd.f32 %v3473_v33, %v3603_v49  ;;  %v710_v14 = vadd.f32 %v3475_v34, %v3603_v49  ;;  %v1153_v51 = vmax.f32 %v722_v61, 0.0  ;;  %v547_v36 = vadd.f32 %v3469_v31, %v3603_v49  ;;  %v4572_v22 = vld [vmem:[#allocation23_spill] sm:$0xff]  ;;  %v4602_v26 = vld [vmem:[#allocation25_spill] sm:$0xff] }
 0x12d   : > { %4562 = vst [vmem:[#allocation42_spill] sm:$0xff] %v3627_v2  ;;  %4563 = vst [vmem:[#allocation43_spill] sm:$0xff] %v3629_v56  ;;  %1346 = vmatprep.subr.mxu0 %v1167_v43  ;;  %1507 = vmatprep.subr.mxu1 %v1169_v62  ;;  %v708_v52 = vadd.f32 %v3471_v32, %v3603_v49  ;;  %v1150_v6 = vmax.f32 %v559_v44, 0.0  ;;  %v1152_v21 = vmax.f32 %v720_v28, 0.0  ;;  %v3657_v33 = vpop.permute.xlu1 %333  ;;  %v1143_v31 = vmax.f32 %v555_v41, 0.0  ;;  %v4571_v32 = vld [vmem:[#allocation22_spill] sm:$0xff] }
 0x12e   : > { %v3639_v25 = vpop.f32.mrf.mxu0  ;;  %v3641_v54 = vpop.f32.mrf.mxu1  ;;  %1347 = vmatpush1.msra.mxu0 %v1166_v59  ;;  %1508 = vmatpush1.msra.mxu1 %v1168_v55  ;;  %4569 = vst [vmem:[#allocation49_spill] sm:$0xff] %v3657_v33  ;;  %v543_v34 = vadd.f32 %v3465_v29, %v3617_v45  ;;  %v704_v63 = vadd.f32 %v4570_v47, %v3617_v45  ;;  %v1145_v48 = vmax.f32 %v716_v42, 0.0  ;;  %v1142_v46 = vmax.f32 %v553_v39, 0.0  ;;  %v4575_v29 = vld [vmem:[#allocation20_spill] sm:$0xff]  ;;  %v4576_v28 = vld [vmem:[#allocation21_spill] sm:$0xff]  ;;  %v4577_v42 = vld [vmem:[#allocation18_spill] sm:$0xff] }
 0x12f   : > { %4564 = vst [vmem:[#allocation44_spill] sm:$0xff] %v3639_v25  ;;  %4565 = vst [vmem:[#allocation45_spill] sm:$0xff] %v3641_v54  ;;  %1348 = vmatprep.subr.mxu0 %v1159_v0  ;;  %1509 = vmatprep.subr.mxu1 %v1161_v12  ;;  %v541_v19 = vadd.f32 %v4571_v32, %v3617_v45  ;;  %v702_v27 = vadd.f32 %v4572_v22, %v3617_v45  ;;  %v1144_v61 = vmax.f32 %v714_v40, 0.0  ;;  %v4578_v12 = vld [vmem:[#allocation19_spill] sm:$0xff]  ;;  %v4603_v25 = vld [vmem:[#allocation26_spill] sm:$0xff] }
 0x130   : > { %v3653_v50 = vpop.f32.mrf.mxu0  ;;  %v3655_v4 = vpop.f32.mrf.mxu1  ;;  %1349 = vmatpush1.msra.mxu0 %v1158_v18  ;;  %1510 = vmatpush1.msra.mxu1 %v1160_v53  ;;  %v537_v44 = vadd.f32 %v4575_v29, %v3643_v37  ;;  %v698_v59 = vadd.f32 %v4576_v28, %v3643_v37  ;;  %v1135_v55 = vmax.f32 %v549_v38, 0.0  ;;  %v1137_v41 = vmax.f32 %v710_v14, 0.0  ;;  %v4580_v38 = vld [vmem:[#allocation16_spill] sm:$0xff] }
 0x131   : > { %4567 = vst [vmem:[#allocation47_spill] sm:$0xff] %v3653_v50  ;;  %4568 = vst [vmem:[#allocation48_spill] sm:$0xff] %v3655_v4  ;;  %1350 = vmatprep.subr.mxu0 %v1151_v35  ;;  %1511 = vmatprep.subr.mxu1 %v1153_v51  ;;  %v535_v0 = vadd.f32 %v4577_v42, %v3643_v37  ;;  %v696_v39 = vadd.f32 %v4578_v12, %v3643_v37  ;;  %v1134_v40 = vmax.f32 %v547_v36, 0.0  ;;  %v3683_v51 = vpop.permute.xlu0 %328  ;;  %v4582_v36 = vld [vmem:[#allocation14_spill] sm:$0xff]  ;;  %v3697_v28 = vpop.permute.xlu1 %323 }
 0x132   : > { %v3667_v43 = vpop.f32.mrf.mxu0  ;;  %v3669_v62 = vpop.f32.mrf.mxu1  ;;  %1351 = vmatpush1.msra.mxu0 %v1150_v6  ;;  %1512 = vmatpush1.msra.mxu1 %v1152_v21  ;;  %v1136_v18 = vmax.f32 %v708_v52, 0.0  ;;  %4579 = vst [vmem:[#allocation23_spill] sm:$0xff] %v3683_v51  ;;  %v531_v14 = vadd.f32 %v4580_v38, %v3657_v33  ;;  %v4581_v6 = vld [vmem:[#allocation17_spill] sm:$0xff]  ;;  %v1127_v47 = vmax.f32 %v543_v34, 0.0  ;;  %v529_v52 = vadd.f32 %v4582_v36, %v3657_v33  ;;  %v4585_v34 = vld [vmem:[#allocation12_spill] sm:$0xff]  ;;  %v4588_v38 = vld [vmem:[#allocation11_spill] sm:$0xff] }
 0x133   : > { %4573 = vst [vmem:[#allocation24_spill] sm:$0xff] %v3667_v43  ;;  %4574 = vst [vmem:[#allocation22_spill] sm:$0xff] %v3669_v62  ;;  %1352 = vmatprep.subr.mxu0 %v1143_v31  ;;  %1513 = vmatprep.subr.mxu1 %v1145_v48  ;;  %v692_v21 = vadd.f32 %v4581_v6, %v3657_v33  ;;  %v1129_v31 = vmax.f32 %v704_v63, 0.0  ;;  %v4583_v48 = vld [vmem:[#allocation15_spill] sm:$0xff]  ;;  %v1126_v22 = vmax.f32 %v541_v19, 0.0  ;;  %v1119_v42 = vmax.f32 %v537_v44, 0.0 }
 0x134   : > { %v3679_v53 = vpop.f32.mrf.mxu0  ;;  %v3681_v35 = vpop.f32.mrf.mxu1  ;;  %1353 = vmatpush1.msra.mxu0 %v1142_v46  ;;  %1514 = vmatpush1.msra.mxu1 %v1144_v61  ;;  %v690_v32 = vadd.f32 %v4583_v48, %v3657_v33  ;;  %v1128_v46 = vmax.f32 %v702_v27, 0.0  ;;  %4584 = vst [vmem:[#allocation20_spill] sm:$0xff] %v3697_v28  ;;  %v525_v63 = vadd.f32 %v4585_v34, %v3683_v51  ;;  %v1121_v12 = vmax.f32 %v698_v59, 0.0  ;;  %v4587_v19 = vld [vmem:[#allocation10_spill] sm:$0xff]  ;;  %v4589_v34 = vld [vmem:[#allocation8_spill] sm:$0xff]  ;;  %v4590_v59 = vld [vmem:[#allocation9_spill] sm:$0xff] }
 0x135   : > { %1354 = vmatprep.subr.mxu0 %v1135_v55  ;;  %1515 = vmatprep.subr.mxu1 %v1137_v41  ;;  %v4586_v55 = vld [vmem:[#allocation13_spill] sm:$0xff]  ;;  %v523_v27 = vadd.f32 %v4587_v19, %v3683_v51  ;;  %v684_v6 = vadd.f32 %v4588_v38, %v3683_v51  ;;  %v519_v44 = vadd.f32 %v4589_v34, %v3697_v28  ;;  %v4591_v19 = vld [vmem:[#allocation6_spill] sm:$0xff]  ;;  %v1110_v9 = vmax.f32 %v529_v52, 0.0 }
 0x136   : > { %v3693_v61 = vpop.f32.mrf.mxu0  ;;  %v3695_v29 = vpop.f32.mrf.mxu1  ;;  %1355 = vmatpush1.msra.mxu0 %v1134_v40  ;;  %1516 = vmatpush1.msra.mxu1 %v1136_v18  ;;  %v686_v41 = vadd.f32 %v4586_v55, %v3683_v51  ;;  %v1118_v40 = vmax.f32 %v535_v0, 0.0  ;;  %v1120_v18 = vmax.f32 %v696_v39, 0.0  ;;  %v1113_v55 = vmax.f32 %v692_v21, 0.0  ;;  %v4592_v39 = vld [vmem:[#allocation7_spill] sm:$0xff]  ;;  %4599 = vst [vmem:[#allocation14_spill] sm:$0xff] %v3811_v16 }
 0x137   : > { %1356 = vmatprep.subr.mxu0 %v1127_v47  ;;  %1517 = vmatprep.subr.mxu1 %v1129_v31  ;;  %v680_v47 = vadd.f32 %v4590_v59, %v3697_v28  ;;  %v1111_v31 = vmax.f32 %v531_v14, 0.0  ;;  %v517_v0 = vadd.f32 %v4591_v19, %v3697_v28  ;;  %v678_v38 = vadd.f32 %v4592_v39, %v3697_v28 }
 0x138   : > { %v3707_v36 = vpop.f32.mrf.mxu0  ;;  %v3709_v48 = vpop.f32.mrf.mxu1  ;;  %1357 = vmatpush1.msra.mxu0 %v1126_v22  ;;  %1518 = vmatpush1.msra.mxu1 %v1128_v46  ;;  %v1112_v30 = vmax.f32 %v690_v32, 0.0  ;;  %v1103_v34 = vmax.f32 %v525_v63, 0.0  ;;  %v1105_v59 = vmax.f32 %v686_v41, 0.0  ;;  %v1102_v14 = vmax.f32 %v523_v27, 0.0  ;;  %v3734_v41 = vld [vmem:[%s4482_s3] sm:$0xff] }
 0x139   : > { %1358 = vmatprep.subr.mxu0 %v1119_v42  ;;  %1519 = vmatprep.subr.mxu1 %v1121_v12  ;;  %v1104_v21 = vmax.f32 %v684_v6, 0.0  ;;  %v1095_v52 = vmax.f32 %v519_v44, 0.0  ;;  %v1097_v32 = vmax.f32 %v680_v47, 0.0  ;;  %v1094_v19 = vmax.f32 %v517_v0, 0.0  ;;  %4593 = vst [vmem:[#allocation21_spill] sm:$0xff] %v3734_v41  ;;  %v3751_v44 = vld [vmem:[%s4482_s3 + $0x8] sm:$0xff] }
 0x13a   : > { %v3719_v22 = vpop.f32.mrf.mxu0  ;;  %v3721_v46 = vpop.f32.mrf.mxu1  ;;  %1359 = vmatpush1.msra.mxu0 %v1118_v40  ;;  %1520 = vmatpush1.msra.mxu1 %v1120_v18  ;;  %v1096_v39 = vmax.f32 %v678_v38, 0.0  ;;  %v4594_v18 = vmov 0.0   ;;  %4595 = vst [vmem:[#allocation18_spill] sm:$0xff] %v3751_v44  ;;  %v3768_v38 = vld [vmem:[%s4482_s3 + $0x10] sm:$0xff] }
 0x13b   : > { %1360 = vmatprep.subr.mxu0 %v1111_v31  ;;  %1521 = vmatprep.subr.mxu1 %v1113_v55  ;;  %4596 = vst [vmem:[#allocation19_spill] sm:$0xff] %v3768_v38 }
 0x13c   : > { %v3723_v42 = vpop.f32.mrf.mxu0  ;;  %v3725_v12 = vpop.f32.mrf.mxu1  ;;  %1361 = vmatpush1.msra.mxu0 %v1110_v9  ;;  %1522 = vmatpush1.msra.mxu1 %v1112_v30 }
 0x13d   : > { %1362 = vmatprep.subr.mxu0 %v1103_v34  ;;  %1523 = vmatprep.subr.mxu1 %v1105_v59 }
 0x13e   : > { %v3727_v40 = vpop.f32.mrf.mxu0  ;;  %v3729_v63 = vpop.f32.mrf.mxu1  ;;  %1363 = vmatpush1.msra.mxu0 %v1102_v14  ;;  %1524 = vmatpush1.msra.mxu1 %v1104_v21 }
 0x13f   : > { %1364 = vmatprep.subr.mxu0 %v1095_v52  ;;  %1525 = vmatprep.subr.mxu1 %v1097_v32  ;;  %v3785_v52 = vld [vmem:[%s4482_s3 + $0x18] sm:$0xff] }
 0x140   : > { %v3736_v30 = vpop.f32.mrf.mxu0  ;;  %v3738_v9 = vpop.f32.mrf.mxu1  ;;  %1365 = vmatpush1.msra.mxu0 %v1094_v19  ;;  %1526 = vmatpush1.msra.mxu1 %v1096_v39  ;;  %4597 = vst [vmem:[#allocation16_spill] sm:$0xff] %v3785_v52 }
 0x141   : > { %1399 = vmatmul.mubr.f32.vlgmr.msra.gmra.mxu0 %v3734_v41  ;;  %1560 = vmatmul.mubr.f32.vlgmr.msra.gmra.mxu1 %v3734_v41 }
 0x142   : > { %v3742_v27 = vpop.f32.mrf.mxu0  ;;  %v3744_v6 = vpop.f32.mrf.mxu1  ;;  %1404 = vmatprep.mubr.f32.mxu0 %v4594_v18  ;;  %1565 = vmatprep.mubr.f32.mxu1 %v4594_v18 }
 0x144   : > { %v3753_v47 = vpop.f32.mrf.mxu0  ;;  %v3755_v31 = vpop.f32.mrf.mxu1 }
 0x145   : > { %1405 = vmatmul.mubr.f32.gmra.mxu0 %v3751_v44  ;;  %1566 = vmatmul.mubr.f32.gmra.mxu1 %v3751_v44  ;;  %v3802_v44 = vld [vmem:[%s4482_s3 + $0x20] sm:$0xff] }
 0x146   : > { %v3759_v55 = vpop.f32.mrf.mxu0  ;;  %v3761_v0 = vpop.f32.mrf.mxu1  ;;  %1410 = vmatprep.mubr.f32.mxu0 %v4594_v18  ;;  %1571 = vmatprep.mubr.f32.mxu1 %v4594_v18  ;;  %4598 = vst [vmem:[#allocation17_spill] sm:$0xff] %v3802_v44 }
 0x148   : > { %v3770_v34 = vpop.f32.mrf.mxu0  ;;  %v3772_v59 = vpop.f32.mrf.mxu1 }
 0x149   : > { %1411 = vmatmul.mubr.f32.gmra.mxu0 %v3768_v38  ;;  %1572 = vmatmul.mubr.f32.gmra.mxu1 %v3768_v38 }
 0x14a   : > { %v3776_v14 = vpop.f32.mrf.mxu0  ;;  %v3778_v21 = vpop.f32.mrf.mxu1  ;;  %1416 = vmatprep.mubr.f32.mxu0 %v4594_v18  ;;  %1577 = vmatprep.mubr.f32.mxu1 %v4594_v18 }
 0x14c   : > { %v3787_v32 = vpop.f32.mrf.mxu0  ;;  %v3789_v19 = vpop.f32.mrf.mxu1 }
 0x14d   : > { %1417 = vmatmul.mubr.f32.gmra.mxu0 %v3785_v52  ;;  %1578 = vmatmul.mubr.f32.gmra.mxu1 %v3785_v52 }
 0x14e   : > { %v3793_v39 = vpop.f32.mrf.mxu0  ;;  %v3795_v38 = vpop.f32.mrf.mxu1  ;;  %1422 = vmatprep.mubr.f32.mxu0 %v4594_v18  ;;  %1583 = vmatprep.mubr.f32.mxu1 %v4594_v18 }
 0x150   : > { %v912_v41 = vpop.f32.mrf.mxu0  ;;  %v1073_v28 = vpop.f32.mrf.mxu1 }
 0x151   : > { %1423 = vmatmul.mubr.f32.gmra.mxu0 %v3802_v44  ;;  %1584 = vmatmul.mubr.f32.gmra.mxu1 %v3802_v44  ;;  %v3820_v44 = vld [vmem:[%s4482_s3 + $0x30] sm:$0xff] }
 0x152   : > { %v916_v52 = vpop.f32.mrf.mxu0  ;;  %v1077_v15 = vpop.f32.mrf.mxu1  ;;  %1428 = vmatprep.mubr.f32.mxu0 %v4594_v18  ;;  %1589 = vmatprep.mubr.f32.mxu1 %v4594_v18  ;;  %4600 = vst [vmem:[#allocation15_spill] sm:$0xff] %v3820_v44 }
 0x154   : > { %v918_v1 = vpop.f32.mrf.mxu0  ;;  %v1079_v57 = vpop.f32.mrf.mxu1 }
 0x155   : > { %1429 = vmatmul.mubr.f32.gmra.mxu0 %v3811_v16  ;;  %1590 = vmatmul.mubr.f32.gmra.mxu1 %v3811_v16  ;;  %v3829_v16 = vld [vmem:[%s4482_s3 + $0x38] sm:$0xff] }
 0x156   : > { %v922_v51 = vpop.f32.mrf.mxu0  ;;  %v1083_v8 = vpop.f32.mrf.mxu1  ;;  %1434 = vmatprep.mubr.f32.mxu0 %v4594_v18  ;;  %1595 = vmatprep.mubr.f32.mxu1 %v4594_v18  ;;  %4601 = vst [vmem:[#allocation12_spill] sm:$0xff] %v3829_v16 }
 0x158   : > { %v924_v17 = vpop.f32.mrf.mxu0  ;;  %v1085_v3 = vpop.f32.mrf.mxu1 }
 0x159   : > { %1435 = vmatmul.mubr.f32.gmra.mxu0 %v3820_v44  ;;  %1596 = vmatmul.mubr.f32.gmra.mxu1 %v3820_v44  ;;  %v925_v4 = vadd.f32 %v924_v17, %v4603_v25  ;;  %v1086_v50 = vadd.f32 %v1085_v3, %v4603_v25  ;;  %v919_v17 = vadd.f32 %v918_v1, %v3523_v60 }
 0x15a   : > { %v928_v24 = vpop.f32.mrf.mxu0  ;;  %v1089_v33 = vpop.f32.mrf.mxu1  ;;  %1440 = vmatprep.mubr.f32.mxu0 %v4594_v18  ;;  %1601 = vmatprep.mubr.f32.mxu1 %v4594_v18  ;;  %v1080_v3 = vadd.f32 %v1079_v57, %v3523_v60  ;;  %v3859_v57 = vld [vmem:[%s4482_s3 + $0x48] sm:$0xff] }
 0x15b   : > { %v929_v23 = vadd.f32 %v928_v24, %v4602_v26  ;;  %v1090_v37 = vadd.f32 %v1089_v33, %v4602_v26  ;;  %v3844_v24 = vld [vmem:[%s4482_s3 + $0x40] sm:$0xff]  ;;  %v1211_v62 = vmax.f32 %v925_v4, 0.0  ;;  %v1213_v43 = vmax.f32 %v1086_v50, 0.0 }
 0x15c   : > { %v930_v56 = vpop.f32.mrf.mxu0  ;;  %v1091_v2 = vpop.f32.mrf.mxu1  ;;  %v1205_v1 = vmax.f32 %v1080_v3, 0.0  ;;  %v907_v4 = vadd.f32 %v3787_v32, %v3529_v10  ;;  %v3909_v3 = vld [vmem:[%s4482_s3 + $0x58] sm:$0xff] }
 0x15d   : > { %v931_v54 = vadd.f32 %v930_v56, %v4602_v26  ;;  %v1092_v44 = vadd.f32 %v1091_v2, %v4602_v26  ;;  %1441 = vmatmul.mubr.f32.gmra.mxu0 %v3829_v16  ;;  %1602 = vmatmul.mubr.f32.gmra.mxu1 %v3829_v16  ;;  %v923_v26 = vadd.f32 %v922_v51, %v4603_v25  ;;  %v1218_v16 = vmax.f32 %v929_v23, 0.0 }
 0x15e   : > { %1446 = vmatprep.mubr.f32.mxu0 %v4594_v18  ;;  %1607 = vmatprep.mubr.f32.mxu1 %v4594_v18  ;;  %v1084_v2 = vadd.f32 %v1083_v8, %v4603_v25  ;;  %v1220_v45 = vmax.f32 %v1090_v37, 0.0  ;;  %v1078_v51 = vadd.f32 %v1077_v15, %v3523_v60  ;;  %v913_v8 = vadd.f32 %v912_v41, %v3527_v5 }
 0x15f   : > { %v1219_v56 = vmax.f32 %v931_v54, 0.0  ;;  %v1221_v33 = vmax.f32 %v1092_v44, 0.0  ;;  %v917_v54 = vadd.f32 %v916_v52, %v3523_v60  ;;  %v1074_v23 = vadd.f32 %v1073_v28, %v3527_v5 }
 0x160   : > { %v1210_v25 = vmax.f32 %v923_v26, 0.0  ;;  %v1212_v37 = vmax.f32 %v1084_v2, 0.0  ;;  %v911_v60 = vadd.f32 %v3793_v39, %v3527_v5  ;;  %v1203_v15 = vmax.f32 %v919_v17, 0.0 }
 0x161   : > { %1447 = vmatmul.mubr.f32.gmra.mxu0 %v3844_v24  ;;  %1608 = vmatmul.mubr.f32.gmra.mxu1 %v3844_v24  ;;  %v1204_v50 = vmax.f32 %v1078_v51, 0.0  ;;  %v1197_v28 = vmax.f32 %v1074_v23, 0.0  ;;  %v1066_v41 = vadd.f32 %v3778_v21, %v3529_v10  ;;  %v901_v44 = vadd.f32 %v3770_v34, %v3531_v11 }
 0x162   : > { %1656 = vmatprep.subr.mxu0 %v1219_v56  ;;  %1817 = vmatprep.subr.mxu1 %v1221_v33  ;;  %v1194_v52 = vmax.f32 %v911_v60, 0.0  ;;  %v1060_v34 = vadd.f32 %v3761_v0, %v3531_v11  ;;  %v895_v56 = vadd.f32 %v3753_v47, %v3535_v20  ;;  %v1056_v33 = vadd.f32 %v3755_v31, %v3535_v20  ;;  %v3934_v60 = vld [vmem:[%s4482_s3 + $0x60] sm:$0xff] }
 0x163   : > { %1657 = vmatpush1.msra.mxu0 %v1218_v16  ;;  %1818 = vmatpush1.msra.mxu1 %v1220_v45  ;;  %v1072_v16 = vadd.f32 %v3795_v38, %v3527_v5  ;;  %v1202_v45 = vmax.f32 %v917_v54, 0.0  ;;  %v905_v5 = vadd.f32 %v3776_v14, %v3529_v10  ;;  %v1062_v38 = vadd.f32 %v3772_v59, %v3531_v11 }
 0x164   : > { %1658 = vmatprep.subr.mxu0 %v1211_v62  ;;  %1819 = vmatprep.subr.mxu1 %v1213_v43  ;;  %v1068_v43 = vadd.f32 %v3789_v19, %v3529_v10  ;;  %v1195_v62 = vmax.f32 %v913_v8, 0.0  ;;  %v3884_v19 = vld [vmem:[%s4482_s3 + $0x50] sm:$0xff]  ;;  %v899_v10 = vadd.f32 %v3759_v55, %v3531_v11  ;;  %v1187_v59 = vmax.f32 %v907_v4, 0.0 }
 0x165   : > { %1452 = vmatprep.mubr.f32.mxu0 %v4594_v18  ;;  %1613 = vmatprep.mubr.f32.mxu1 %v4594_v18  ;;  %v1196_v32 = vmax.f32 %v1072_v16, 0.0  ;;  %v1186_v21 = vmax.f32 %v905_v5, 0.0  ;;  %v1188_v39 = vmax.f32 %v1066_v41, 0.0  ;;  %v1179_v55 = vmax.f32 %v901_v44, 0.0  ;;  %v3959_v44 = vld [vmem:[%s4482_s3 + $0x68] sm:$0xff] }
 0x166   : > { %1659 = vmatpush1.msra.mxu0 %v1210_v25  ;;  %1820 = vmatpush1.msra.mxu1 %v1212_v37  ;;  %v1189_v14 = vmax.f32 %v1068_v43, 0.0  ;;  %v1181_v26 = vmax.f32 %v1062_v38, 0.0  ;;  %v893_v11 = vadd.f32 %v3742_v27, %v3535_v20  ;;  %v1054_v0 = vadd.f32 %v3744_v6, %v3535_v20  ;;  %v4606_v43 = vld [vmem:[#allocation41_spill] sm:$0xff] }
 0x167   : > { %1453 = vmatmul.mubr.f32.gmra.mxu0 %v3859_v57  ;;  %1614 = vmatmul.mubr.f32.gmra.mxu1 %v3859_v57  ;;  %v889_v2 = vadd.f32 %v3736_v30, %v3547_v13  ;;  %v1050_v47 = vadd.f32 %v3738_v9, %v3547_v13  ;;  %v1178_v17 = vmax.f32 %v899_v10, 0.0  ;;  %v1180_v31 = vmax.f32 %v1060_v34, 0.0 }
 0x168   : > { %1660 = vmatprep.subr.mxu0 %v1203_v15  ;;  %1821 = vmatprep.subr.mxu1 %v1205_v1  ;;  %v887_v20 = vadd.f32 %v3727_v40, %v3547_v13  ;;  %v1048_v30 = vadd.f32 %v3729_v63, %v3547_v13  ;;  %v1171_v9 = vmax.f32 %v895_v56, 0.0  ;;  %v1173_v27 = vmax.f32 %v1056_v33, 0.0  ;;  %v4613_v33 = vld [vmem:[#allocation43_spill] sm:$0xff] }
 0x169   : > { %1661 = vmatpush1.msra.mxu0 %v1202_v45  ;;  %1822 = vmatpush1.msra.mxu1 %v1204_v50  ;;  %v1170_v6 = vmax.f32 %v893_v11, 0.0  ;;  %v1172_v54 = vmax.f32 %v1054_v0, 0.0  ;;  %v883_v51 = vadd.f32 %v3723_v42, %v3565_v7  ;;  %v1044_v8 = vadd.f32 %v3725_v12, %v3565_v7  ;;  %v4605_v50 = vld [vmem:[#allocation22_spill] sm:$0xff]  ;;  %v4614_v0 = vld [vmem:[#allocation39_spill] sm:$0xff] }
 0x16a   : > { %1662 = vmatprep.subr.mxu0 %v1195_v62  ;;  %1823 = vmatprep.subr.mxu1 %v1197_v28  ;;  %v1163_v40 = vmax.f32 %v889_v2, 0.0  ;;  %v1165_v23 = vmax.f32 %v1050_v47, 0.0  ;;  %v881_v13 = vadd.f32 %v3719_v22, %v3565_v7  ;;  %v1042_v63 = vadd.f32 %v3721_v46, %v3565_v7  ;;  %v4607_v62 = vld [vmem:[#allocation47_spill] sm:$0xff]  ;;  %v4615_v47 = vld [vmem:[#allocation40_spill] sm:$0xff] }
 0x16b   : > { %1458 = vmatprep.mubr.f32.mxu0 %v4594_v18  ;;  %1619 = vmatprep.mubr.f32.mxu1 %v4594_v18  ;;  %v877_v25 = vadd.f32 %v3707_v36, %v3577_v58  ;;  %v1038_v42 = vadd.f32 %v3709_v48, %v3577_v58  ;;  %v1162_v37 = vmax.f32 %v887_v20, 0.0  ;;  %v1164_v12 = vmax.f32 %v1048_v30, 0.0  ;;  %v4617_v20 = vld [vmem:[#allocation37_spill] sm:$0xff] }
 0x16c   : > { %1663 = vmatpush1.msra.mxu0 %v1194_v52  ;;  %1824 = vmatpush1.msra.mxu1 %v1196_v32  ;;  %v875_v7 = vadd.f32 %v3693_v61, %v3577_v58  ;;  %v1036_v36 = vadd.f32 %v3695_v29, %v3577_v58  ;;  %v1155_v48 = vmax.f32 %v883_v51, 0.0  ;;  %v1157_v22 = vmax.f32 %v1044_v8, 0.0  ;;  %v4604_v58 = vld [vmem:[#allocation24_spill] sm:$0xff]  ;;  %v4610_v52 = vld [vmem:[#allocation45_spill] sm:$0xff]  ;;  %v3984_v51 = vld [vmem:[%s4482_s3 + $0x70] sm:$0xff] }
 0x16d   : > { %1459 = vmatmul.mubr.f32.gmra.mxu0 %v3884_v19  ;;  %1620 = vmatmul.mubr.f32.gmra.mxu1 %v3884_v19  ;;  %v1154_v46 = vmax.f32 %v881_v13, 0.0  ;;  %v1156_v16 = vmax.f32 %v1042_v63, 0.0  ;;  %v871_v15 = vadd.f32 %v3679_v53, %v3603_v49  ;;  %v1032_v1 = vadd.f32 %v3681_v35, %v3603_v49  ;;  %v4608_v53 = vld [vmem:[#allocation48_spill] sm:$0xff]  ;;  %v4619_v8 = vld [vmem:[#allocation35_spill] sm:$0xff] }
 0x16e   : > { %1664 = vmatprep.subr.mxu0 %v1187_v59  ;;  %1825 = vmatprep.subr.mxu1 %v1189_v14  ;;  %v1147_v61 = vmax.f32 %v877_v25, 0.0  ;;  %v1149_v45 = vmax.f32 %v1038_v42, 0.0  ;;  %v869_v29 = vadd.f32 %v4604_v58, %v3603_v49  ;;  %v1030_v4 = vadd.f32 %v4605_v50, %v3603_v49  ;;  %v4609_v49 = vld [vmem:[#allocation44_spill] sm:$0xff] }
 0x16f   : > { %1665 = vmatpush1.msra.mxu0 %v1186_v21  ;;  %1826 = vmatpush1.msra.mxu1 %v1188_v39  ;;  %v865_v28 = vadd.f32 %v4607_v62, %v4606_v43  ;;  %v1026_v5 = vadd.f32 %v4608_v53, %v4606_v43  ;;  %v1146_v41 = vmax.f32 %v875_v7, 0.0  ;;  %v1148_v35 = vmax.f32 %v1036_v36, 0.0  ;;  %v4611_v21 = vld [vmem:[#allocation46_spill] sm:$0xff]  ;;  %v4622_v7 = vld [vmem:[#allocation33_spill] sm:$0xff]  ;;  %v4626_v58 = vld [vmem:[#allocation20_spill] sm:$0xff] }
 0x170   : > { %1666 = vmatprep.subr.mxu0 %v1179_v55  ;;  %1827 = vmatprep.subr.mxu1 %v1181_v26  ;;  %v863_v38 = vadd.f32 %v4609_v49, %v4606_v43  ;;  %v1024_v32 = vadd.f32 %v4610_v52, %v4606_v43  ;;  %v1139_v10 = vmax.f32 %v871_v15, 0.0  ;;  %v1141_v34 = vmax.f32 %v1032_v1, 0.0  ;;  %v4612_v39 = vld [vmem:[#allocation42_spill] sm:$0xff]  ;;  %v4624_v15 = vld [vmem:[#allocation31_spill] sm:$0xff] }
 0x171   : > { %1464 = vmatprep.mubr.f32.mxu0 %v4594_v18  ;;  %1625 = vmatprep.mubr.f32.mxu1 %v4594_v18  ;;  %v1138_v59 = vmax.f32 %v869_v29, 0.0  ;;  %v1140_v14 = vmax.f32 %v1030_v4, 0.0  ;;  %v859_v56 = vadd.f32 %v4612_v39, %v4611_v21  ;;  %v1020_v55 = vadd.f32 %v4613_v33, %v4611_v21  ;;  %v4627_v29 = vld [vmem:[#allocation29_spill] sm:$0xff]  ;;  %v4628_v4 = vld [vmem:[#allocation30_spill] sm:$0xff]  ;;  %v4009_v53 = vld [vmem:[%s4482_s3 + $0x78] sm:$0xff] }
 0x172   : > { %1667 = vmatpush1.msra.mxu0 %v1178_v17  ;;  %1828 = vmatpush1.msra.mxu1 %v1180_v31  ;;  %v1131_v26 = vmax.f32 %v865_v28, 0.0  ;;  %v1133_v11 = vmax.f32 %v1026_v5, 0.0  ;;  %v857_v2 = vadd.f32 %v4614_v0, %v4611_v21  ;;  %v1018_v17 = vadd.f32 %v4615_v47, %v4611_v21  ;;  %v4616_v31 = vld [vmem:[#allocation49_spill] sm:$0xff]  ;;  %v4629_v5 = vld [vmem:[#allocation27_spill] sm:$0xff] }
 0x173   : > { %1465 = vmatmul.mubr.f32.gmra.mxu0 %v3909_v3  ;;  %1626 = vmatmul.mubr.f32.gmra.mxu1 %v3909_v3  ;;  %v853_v30 = vadd.f32 %v4617_v20, %v4616_v31  ;;  %v1123_v63 = vmax.f32 %v859_v56, 0.0  ;;  %v1125_v25 = vmax.f32 %v1020_v55, 0.0  ;;  %v841_v50 = vadd.f32 %v4627_v29, %v4626_v58  ;;  %v4631_v39 = vld [vmem:[#allocation21_spill] sm:$0xff]  ;;  %v4632_v56 = vld [vmem:[#allocation18_spill] sm:$0xff]  ;;  %v4633_v33 = vld [vmem:[#allocation19_spill] sm:$0xff] }
 0x174   : > { %1668 = vmatprep.subr.mxu0 %v1171_v9  ;;  %1829 = vmatprep.subr.mxu1 %v1173_v27  ;;  %v4618_v9 = vld [vmem:[#allocation38_spill] sm:$0xff]  ;;  %v1122_v42 = vmax.f32 %v857_v2, 0.0  ;;  %v1002_v43 = vadd.f32 %v4628_v4, %v4626_v58  ;;  %v4634_v55 = vld [vmem:[#allocation16_spill] sm:$0xff]  ;;  %v4637_v0 = vld [vmem:[#allocation15_spill] sm:$0xff] }
 0x175   : > { %1669 = vmatpush1.msra.mxu0 %v1170_v6  ;;  %1830 = vmatpush1.msra.mxu1 %v1172_v54  ;;  %v1014_v27 = vadd.f32 %v4618_v9, %v4616_v31  ;;  %v1130_v6 = vmax.f32 %v863_v38, 0.0  ;;  %v1132_v54 = vmax.f32 %v1024_v32, 0.0  ;;  %v4638_v2 = vld [vmem:[#allocation12_spill] sm:$0xff] }
 0x176   : > { %1670 = vmatprep.subr.mxu0 %v1163_v40  ;;  %1831 = vmatprep.subr.mxu1 %v1165_v23  ;;  %v851_v40 = vadd.f32 %v4619_v8, %v4616_v31  ;;  %v4620_v23 = vld [vmem:[#allocation36_spill] sm:$0xff] }
 0x177   : > { %1470 = vmatprep.mubr.f32.mxu0 %v4594_v18  ;;  %1631 = vmatprep.mubr.f32.mxu1 %v4594_v18  ;;  %v1012_v13 = vadd.f32 %v4620_v23, %v4616_v31 }
 0x178   : > { %1671 = vmatpush1.msra.mxu0 %v1162_v37  ;;  %1832 = vmatpush1.msra.mxu1 %v1164_v12  ;;  %v1124_v37 = vmax.f32 %v1018_v17, 0.0  ;;  %v4621_v12 = vld [vmem:[#allocation23_spill] sm:$0xff]  ;;  %v1114_v62 = vmax.f32 %v851_v40, 0.0 }
 0x179   : > { %1471 = vmatmul.mubr.f32.gmra.mxu0 %v3934_v60  ;;  %1632 = vmatmul.mubr.f32.gmra.mxu1 %v3934_v60  ;;  %v847_v36 = vadd.f32 %v4622_v7, %v4621_v12  ;;  %v845_v1 = vadd.f32 %v4624_v15, %v4621_v12  ;;  %v1116_v28 = vmax.f32 %v1012_v13, 0.0 }
 0x17a   : > { %1672 = vmatprep.subr.mxu0 %v1155_v48  ;;  %1833 = vmatprep.subr.mxu1 %v1157_v22  ;;  %v4623_v48 = vld [vmem:[#allocation34_spill] sm:$0xff] }
 0x17b   : > { %1673 = vmatpush1.msra.mxu0 %v1154_v46  ;;  %1834 = vmatpush1.msra.mxu1 %v1156_v16  ;;  %v1008_v22 = vadd.f32 %v4623_v48, %v4621_v12  ;;  %v1115_v46 = vmax.f32 %v853_v30, 0.0  ;;  %v1117_v16 = vmax.f32 %v1014_v27, 0.0  ;;  %v1107_v38 = vmax.f32 %v847_v36, 0.0 }
 0x17c   : > { %1674 = vmatprep.subr.mxu0 %v1147_v61  ;;  %1835 = vmatprep.subr.mxu1 %v1149_v45  ;;  %v4625_v61 = vld [vmem:[#allocation32_spill] sm:$0xff]  ;;  %v1106_v32 = vmax.f32 %v845_v1, 0.0 }
 0x17d   : > { %1476 = vmatprep.mubr.f32.mxu0 %v4594_v18  ;;  %1637 = vmatprep.mubr.f32.mxu1 %v4594_v18  ;;  %v1006_v45 = vadd.f32 %v4625_v61, %v4621_v12  ;;  %v1109_v52 = vmax.f32 %v1008_v22, 0.0 }
 0x17e   : > { %1675 = vmatpush1.msra.mxu0 %v1146_v41  ;;  %1836 = vmatpush1.msra.mxu1 %v1148_v35  ;;  %v839_v41 = vadd.f32 %v4629_v5, %v4626_v58  ;;  %v4630_v35 = vld [vmem:[#allocation28_spill] sm:$0xff] }
 0x17f   : > { %1477 = vmatmul.mubr.f32.gmra.mxu0 %v3959_v44  ;;  %1638 = vmatmul.mubr.f32.gmra.mxu1 %v3959_v44  ;;  %v1000_v49 = vadd.f32 %v4630_v35, %v4626_v58 }
 0x180   : > { %1676 = vmatprep.subr.mxu0 %v1139_v10  ;;  %1837 = vmatprep.subr.mxu1 %v1141_v34  ;;  %v1108_v10 = vmax.f32 %v1006_v45, 0.0  ;;  %v1099_v34 = vmax.f32 %v841_v50, 0.0 }
 0x181   : > { %1677 = vmatpush1.msra.mxu0 %v1138_v59  ;;  %1838 = vmatpush1.msra.mxu1 %v1140_v14  ;;  %v1101_v59 = vmax.f32 %v1002_v43, 0.0  ;;  %v1098_v14 = vmax.f32 %v839_v41, 0.0  ;;  %v1100_v21 = vmax.f32 %v1000_v49, 0.0 }
 0x182   : > { %1678 = vmatprep.subr.mxu0 %v1131_v26  ;;  %1839 = vmatprep.subr.mxu1 %v1133_v11  ;;  %v4635_v26 = vld [vmem:[#allocation17_spill] sm:$0xff]  ;;  %v4636_v11 = vld [vmem:[#allocation14_spill] sm:$0xff] }
 0x183   : > { %1482 = vmatprep.mubr.f32.mxu0 %v4594_v18  ;;  %1643 = vmatprep.mubr.f32.mxu1 %v4594_v18 }
 0x184   : > { %1679 = vmatpush1.msra.mxu0 %v1130_v6  ;;  %1840 = vmatpush1.msra.mxu1 %v1132_v54 }
 0x185   : > { %1483 = vmatmul.mubr.f32.gmra.mxu0 %v3984_v51  ;;  %1644 = vmatmul.mubr.f32.gmra.mxu1 %v3984_v51 }
 0x186   : > { %1680 = vmatprep.subr.mxu0 %v1123_v63  ;;  %1841 = vmatprep.subr.mxu1 %v1125_v25 }
 0x187   : > { %1681 = vmatpush1.msra.mxu0 %v1122_v42  ;;  %1842 = vmatpush1.msra.mxu1 %v1124_v37 }
 0x188   : > { %1682 = vmatprep.subr.mxu0 %v1115_v46  ;;  %1843 = vmatprep.subr.mxu1 %v1117_v16 }
 0x189   : > { %1488 = vmatprep.mubr.f32.mxu0 %v4594_v18  ;;  %1649 = vmatprep.mubr.f32.mxu1 %v4594_v18 }
 0x18a   : > { %1683 = vmatpush1.msra.mxu0 %v1114_v62  ;;  %1844 = vmatpush1.msra.mxu1 %v1116_v28 }
 0x18b   : > { %1489 = vmatmul.mubr.f32.gmra.mxu0 %v4009_v53  ;;  %1650 = vmatmul.mubr.f32.gmra.mxu1 %v4009_v53 }
 0x18c   : > { %1684 = vmatprep.subr.mxu0 %v1107_v38  ;;  %1845 = vmatprep.subr.mxu1 %v1109_v52 }
 0x18d   : > { %1685 = vmatpush1.msra.mxu0 %v1106_v32  ;;  %1846 = vmatpush1.msra.mxu1 %v1108_v10 }
 0x18e   : > { %1686 = vmatprep.subr.mxu0 %v1099_v34  ;;  %1847 = vmatprep.subr.mxu1 %v1101_v59 }
 0x18f   : > { %1687 = vmatpush1.msra.mxu0 %v1098_v14  ;;  %1720 = vmatprep.mubr.f32.mxu0 %v4594_v18 }
 0x190   : > { %1848 = vmatpush1.msra.mxu1 %v1100_v21  ;;  %1881 = vmatprep.mubr.f32.mxu1 %v4594_v18 }
 0x191   : > { %1721 = vmatmul.mubr.f32.vlgmr.msra.gmra.mxu0 %v4631_v39  ;;  %1882 = vmatmul.mubr.f32.vlgmr.msra.gmra.mxu1 %v4631_v39 }
 0x192   : > { %1726 = vmatprep.mubr.f32.mxu0 %v4594_v18  ;;  %1887 = vmatprep.mubr.f32.mxu1 %v4594_v18 }
 0x195   : > { %1727 = vmatmul.mubr.f32.gmra.mxu0 %v4632_v56  ;;  %1888 = vmatmul.mubr.f32.gmra.mxu1 %v4632_v56 }
 0x196   : > { %1732 = vmatprep.mubr.f32.mxu0 %v4594_v18  ;;  %1893 = vmatprep.mubr.f32.mxu1 %v4594_v18 }
 0x199   : > { %1733 = vmatmul.mubr.f32.gmra.mxu0 %v4633_v33  ;;  %1894 = vmatmul.mubr.f32.gmra.mxu1 %v4633_v33 }
 0x19a   : > { %1738 = vmatprep.mubr.f32.mxu0 %v4594_v18  ;;  %1899 = vmatprep.mubr.f32.mxu1 %v4594_v18 }
 0x19d   : > { %1739 = vmatmul.mubr.f32.gmra.mxu0 %v4634_v55  ;;  %1900 = vmatmul.mubr.f32.gmra.mxu1 %v4634_v55 }
 0x19e   : > { %1744 = vmatprep.mubr.f32.mxu0 %v4594_v18  ;;  %1905 = vmatprep.mubr.f32.mxu1 %v4594_v18 }
 0x1a1   : > { %1745 = vmatmul.mubr.f32.gmra.mxu0 %v4635_v26  ;;  %1906 = vmatmul.mubr.f32.gmra.mxu1 %v4635_v26 }
 0x1a2   : > { %1750 = vmatprep.mubr.f32.mxu0 %v4594_v18  ;;  %1911 = vmatprep.mubr.f32.mxu1 %v4594_v18 }
 0x1a5   : > { %1751 = vmatmul.mubr.f32.gmra.mxu0 %v4636_v11  ;;  %1912 = vmatmul.mubr.f32.gmra.mxu1 %v4636_v11 }
 0x1a6   : > { %1756 = vmatprep.mubr.f32.mxu0 %v4594_v18  ;;  %1917 = vmatprep.mubr.f32.mxu1 %v4594_v18 }
 0x1a9   : > { %1757 = vmatmul.mubr.f32.gmra.mxu0 %v4637_v0  ;;  %1918 = vmatmul.mubr.f32.gmra.mxu1 %v4637_v0 }
 0x1aa   : > { %1762 = vmatprep.mubr.f32.mxu0 %v4594_v18  ;;  %1923 = vmatprep.mubr.f32.mxu1 %v4594_v18 }
 0x1ad   : > { %1763 = vmatmul.mubr.f32.gmra.mxu0 %v4638_v2  ;;  %1924 = vmatmul.mubr.f32.gmra.mxu1 %v4638_v2 }
 0x1ae   : > { %1768 = vmatprep.mubr.f32.mxu0 %v4594_v18  ;;  %1929 = vmatprep.mubr.f32.mxu1 %v4594_v18 }
 0x1b1   : > { %1769 = vmatmul.mubr.f32.gmra.mxu0 %v3844_v24  ;;  %1930 = vmatmul.mubr.f32.gmra.mxu1 %v3844_v24  ;;  %v4083_v24 = vpop.permute.xlu0 %1256 }
 0x1b2   : > { %1774 = vmatprep.mubr.f32.mxu0 %v4594_v18  ;;  %1935 = vmatprep.mubr.f32.mxu1 %v4594_v18 }
 0x1b5   : > { %1775 = vmatmul.mubr.f32.gmra.mxu0 %v3859_v57  ;;  %1936 = vmatmul.mubr.f32.gmra.mxu1 %v3859_v57  ;;  %v4085_v57 = vpop.permute.xlu1 %1261 }
 0x1b6   : > { %1780 = vmatprep.mubr.f32.mxu0 %v4594_v18  ;;  %1941 = vmatprep.mubr.f32.mxu1 %v4594_v18 }
 0x1b9   : > { %1781 = vmatmul.mubr.f32.gmra.mxu0 %v3884_v19  ;;  %1942 = vmatmul.mubr.f32.gmra.mxu1 %v3884_v19  ;;  %v4087_v19 = vpop.permute.xlu0 %1266 }
 0x1ba   : > { %1786 = vmatprep.mubr.f32.mxu0 %v4594_v18  ;;  %1947 = vmatprep.mubr.f32.mxu1 %v4594_v18 }
 0x1bd   : > { %1787 = vmatmul.mubr.f32.gmra.mxu0 %v3909_v3  ;;  %1948 = vmatmul.mubr.f32.gmra.mxu1 %v3909_v3  ;;  %v4089_v3 = vpop.permute.xlu1 %1271 }
 0x1be   : > { %1792 = vmatprep.mubr.f32.mxu0 %v4594_v18  ;;  %1953 = vmatprep.mubr.f32.mxu1 %v4594_v18 }
 0x1c1   : > { %1793 = vmatmul.mubr.f32.gmra.mxu0 %v3934_v60  ;;  %1954 = vmatmul.mubr.f32.gmra.mxu1 %v3934_v60  ;;  %v4091_v60 = vpop.permute.xlu0 %2124 }
 0x1c2   : > { %1798 = vmatprep.mubr.f32.mxu0 %v4594_v18  ;;  %1959 = vmatprep.mubr.f32.mxu1 %v4594_v18 }
 0x1c5   : > { %1799 = vmatmul.mubr.f32.gmra.mxu0 %v3959_v44  ;;  %1960 = vmatmul.mubr.f32.gmra.mxu1 %v3959_v44  ;;  %v4093_v44 = vpop.permute.xlu1 %2129  ;;  %v4095_v47 = vpop.permute.xlu0 %1276 }
 0x1c6   : > { %1804 = vmatprep.mubr.f32.mxu0 %v4594_v18  ;;  %1965 = vmatprep.mubr.f32.mxu1 %v4594_v18 }
 0x1c9   : > { %1805 = vmatmul.mubr.f32.gmra.mxu0 %v3984_v51  ;;  %1966 = vmatmul.mubr.f32.gmra.mxu1 %v3984_v51  ;;  %v4097_v17 = vpop.permute.xlu1 %2134  ;;  %v4103_v13 = vpop.permute.xlu0 %1281 }
 0x1ca   : > { %1810 = vmatprep.mubr.f32.mxu0 %v4594_v18  ;;  %1971 = vmatprep.mubr.f32.mxu1 %v4594_v18 }
 0x1cd   : > { %1811 = vmatmul.mubr.f32.gmra.mxu0 %v4009_v53  ;;  %1972 = vmatmul.mubr.f32.gmra.mxu1 %v4009_v53  ;;  %v4105_v63 = vpop.permute.xlu1 %2139  ;;  %v4119_v35 = vpop.permute.xlu0 %1286 }
 0x1d1   : > { %v4121_v49 = vpop.permute.xlu1 %2144 }
 0x201   : > { %v1400_v18 = vpop.f32.mrf.mxu0  ;;  %v1561_v31 = vpop.f32.mrf.mxu1 }
 0x202   : > { %v1401_v20 = vadd.f32 %v1400_v18, %v4083_v24  ;;  %v1562_v30 = vadd.f32 %v1561_v31, %v4083_v24 }
 0x203   : > { %v1402_v9 = vpop.f32.mrf.mxu0  ;;  %v1563_v27 = vpop.f32.mrf.mxu1 }
 0x204   : > { %v1403_v6 = vadd.f32 %v1402_v9, %v4083_v24  ;;  %v1564_v54 = vadd.f32 %v1563_v27, %v4083_v24  ;;  %v1978_v51 = vmax.f32 %v1401_v20, 0.0  ;;  %v1980_v8 = vmax.f32 %v1562_v30, 0.0 }
 0x205   : > { %v1406_v40 = vpop.f32.mrf.mxu0  ;;  %v1567_v23 = vpop.f32.mrf.mxu1 }
 0x206   : > { %v1979_v25 = vmax.f32 %v1403_v6, 0.0  ;;  %v1981_v42 = vmax.f32 %v1564_v54, 0.0  ;;  %v1407_v37 = vadd.f32 %v1406_v40, %v4085_v57  ;;  %v1568_v12 = vadd.f32 %v1567_v23, %v4085_v57 }
 0x207   : > { %v1408_v7 = vpop.f32.mrf.mxu0  ;;  %v1569_v36 = vpop.f32.mrf.mxu1  ;;  %v2202_v46 = vmul.f32 %v4091_v60, %v1978_v51  ;;  %v2204_v16 = vmul.f32 %v4091_v60, %v1980_v8 }
 0x208   : > { %v1409_v48 = vadd.f32 %v1408_v7, %v4085_v57  ;;  %v1570_v22 = vadd.f32 %v1569_v36, %v4085_v57  ;;  %v1986_v15 = vmax.f32 %v1407_v37, 0.0  ;;  %v1988_v1 = vmax.f32 %v1568_v12, 0.0  ;;  %v4135_v37 = vpop.permute.xlu0 %1291  ;;  %v4137_v12 = vpop.permute.xlu1 %2149 }
 0x209   : > { %v1412_v61 = vpop.f32.mrf.mxu0  ;;  %v1573_v45 = vpop.f32.mrf.mxu1  ;;  %v2203_v43 = vmul.f32 %v4091_v60, %v1979_v25  ;;  %v2205_v62 = vmul.f32 %v4091_v60, %v1981_v42 }
 0x20a   : > { %v1987_v58 = vmax.f32 %v1409_v48, 0.0  ;;  %v1989_v29 = vmax.f32 %v1570_v22, 0.0  ;;  %v1413_v50 = vadd.f32 %v1412_v61, %v4087_v19  ;;  %v1574_v4 = vadd.f32 %v1573_v45, %v4087_v19 }
 0x20b   : > { %v2210_v28 = vmul.f32 %v4093_v44, %v1986_v15  ;;  %v2212_v53 = vmul.f32 %v4093_v44, %v1988_v1  ;;  %v1414_v5 = vpop.f32.mrf.mxu0  ;;  %v1575_v41 = vpop.f32.mrf.mxu1 }
 0x20c   : > { %v2211_v38 = vmul.f32 %v4093_v44, %v1987_v58  ;;  %v2213_v52 = vmul.f32 %v4093_v44, %v1989_v29  ;;  %v1994_v32 = vmax.f32 %v1413_v50, 0.0  ;;  %v1996_v10 = vmax.f32 %v1574_v4, 0.0 }
 0x20d   : > { %v2330_v34 = vadd.f32 %v2210_v28, %v2202_v46  ;;  %v2372_v59 = vadd.f32 %v2212_v53, %v2204_v16  ;;  %v1415_v14 = vadd.f32 %v1414_v5, %v4087_v19  ;;  %v1576_v21 = vadd.f32 %v1575_v41, %v4087_v19  ;;  %v1418_v39 = vpop.f32.mrf.mxu0  ;;  %v1579_v56 = vpop.f32.mrf.mxu1 }
 0x20e   : > { %v2351_v33 = vadd.f32 %v2211_v38, %v2203_v43  ;;  %v2393_v55 = vadd.f32 %v2213_v52, %v2205_v62  ;;  %v2218_v26 = vmul.f32 %v4097_v17, %v1994_v32  ;;  %v2220_v11 = vmul.f32 %v4097_v17, %v1996_v10 }
 0x20f   : > { %v1995_v0 = vmax.f32 %v1415_v14, 0.0  ;;  %v1997_v2 = vmax.f32 %v1576_v21, 0.0  ;;  %v1419_v18 = vadd.f32 %v1418_v39, %v4089_v3  ;;  %v1580_v31 = vadd.f32 %v1579_v56, %v4089_v3  ;;  %v1420_v20 = vpop.f32.mrf.mxu0  ;;  %v1581_v30 = vpop.f32.mrf.mxu1 }
 0x210   : > { %v2331_v9 = vadd.f32 %v2330_v34, %v2218_v26  ;;  %v2373_v27 = vadd.f32 %v2372_v59, %v2220_v11  ;;  %v1421_v6 = vadd.f32 %v1420_v20, %v4089_v3  ;;  %v1582_v54 = vadd.f32 %v1581_v30, %v4089_v3 }
 0x211   : > { %v2219_v51 = vmul.f32 %v4097_v17, %v1995_v0  ;;  %v2221_v8 = vmul.f32 %v4097_v17, %v1997_v2  ;;  %v2002_v40 = vmax.f32 %v1419_v18, 0.0  ;;  %v2004_v23 = vmax.f32 %v1580_v31, 0.0  ;;  %v1424_v25 = vpop.f32.mrf.mxu0  ;;  %v1585_v42 = vpop.f32.mrf.mxu1 }
 0x212   : > { %v2003_v7 = vmax.f32 %v1421_v6, 0.0  ;;  %v2005_v36 = vmax.f32 %v1582_v54, 0.0  ;;  %v1425_v48 = vadd.f32 %v1424_v25, %v4095_v47  ;;  %v1586_v22 = vadd.f32 %v1585_v42, %v4095_v47 }
 0x213   : > { %v2352_v46 = vadd.f32 %v2351_v33, %v2219_v51  ;;  %v2394_v16 = vadd.f32 %v2393_v55, %v2221_v8  ;;  %v2226_v15 = vmul.f32 %v4105_v63, %v2002_v40  ;;  %v2228_v1 = vmul.f32 %v4105_v63, %v2004_v23  ;;  %v1426_v61 = vpop.f32.mrf.mxu0  ;;  %v1587_v45 = vpop.f32.mrf.mxu1 }
 0x214   : > { %v2227_v58 = vmul.f32 %v4105_v63, %v2003_v7  ;;  %v2229_v29 = vmul.f32 %v4105_v63, %v2005_v36  ;;  %v2010_v50 = vmax.f32 %v1425_v48, 0.0  ;;  %v2012_v4 = vmax.f32 %v1586_v22, 0.0  ;;  %v4151_v33 = vpop.permute.xlu0 %1296  ;;  %v4153_v55 = vpop.permute.xlu1 %2154 }
 0x215   : > { %v2332_v43 = vadd.f32 %v2331_v9, %v2226_v15  ;;  %v2374_v62 = vadd.f32 %v2373_v27, %v2228_v1  ;;  %v1427_v28 = vadd.f32 %v1426_v61, %v4095_v47  ;;  %v1588_v53 = vadd.f32 %v1587_v45, %v4095_v47  ;;  %v1430_v5 = vpop.f32.mrf.mxu0  ;;  %v1591_v41 = vpop.f32.mrf.mxu1 }
 0x216   : > { %v2353_v38 = vadd.f32 %v2352_v46, %v2227_v58  ;;  %v2395_v52 = vadd.f32 %v2394_v16, %v2229_v29  ;;  %v2234_v32 = vmul.f32 %v4121_v49, %v2010_v50  ;;  %v2236_v10 = vmul.f32 %v4121_v49, %v2012_v4 }
 0x217   : > { %v2011_v34 = vmax.f32 %v1427_v28, 0.0  ;;  %v2013_v59 = vmax.f32 %v1588_v53, 0.0  ;;  %v1431_v14 = vadd.f32 %v1430_v5, %v4103_v13  ;;  %v1592_v21 = vadd.f32 %v1591_v41, %v4103_v13  ;;  %v1432_v39 = vpop.f32.mrf.mxu0  ;;  %v1593_v56 = vpop.f32.mrf.mxu1 }
 0x218   : > { %v2333_v26 = vadd.f32 %v2332_v43, %v2234_v32  ;;  %v2375_v11 = vadd.f32 %v2374_v62, %v2236_v10  ;;  %v1433_v0 = vadd.f32 %v1432_v39, %v4103_v13  ;;  %v1594_v2 = vadd.f32 %v1593_v56, %v4103_v13  ;;  %v4167_v50 = vpop.permute.xlu0 %1301  ;;  %v4169_v4 = vpop.permute.xlu1 %2159 }
 0x219   : > { %v2235_v18 = vmul.f32 %v4121_v49, %v2011_v34  ;;  %v2237_v31 = vmul.f32 %v4121_v49, %v2013_v59  ;;  %v2018_v20 = vmax.f32 %v1431_v14, 0.0  ;;  %v2020_v30 = vmax.f32 %v1592_v21, 0.0  ;;  %v1436_v9 = vpop.f32.mrf.mxu0  ;;  %v1597_v27 = vpop.f32.mrf.mxu1 }
 0x21a   : > { %v2019_v6 = vmax.f32 %v1433_v0, 0.0  ;;  %v2021_v54 = vmax.f32 %v1594_v2, 0.0  ;;  %v1437_v51 = vadd.f32 %v1436_v9, %v4119_v35  ;;  %v1598_v8 = vadd.f32 %v1597_v27, %v4119_v35 }
 0x21b   : > { %v2354_v40 = vadd.f32 %v2353_v38, %v2235_v18  ;;  %v2396_v23 = vadd.f32 %v2395_v52, %v2237_v31  ;;  %v2242_v25 = vmul.f32 %v4137_v12, %v2018_v20  ;;  %v2244_v42 = vmul.f32 %v4137_v12, %v2020_v30  ;;  %v1438_v7 = vpop.f32.mrf.mxu0  ;;  %v1599_v36 = vpop.f32.mrf.mxu1 }
 0x21c   : > { %v2243_v48 = vmul.f32 %v4137_v12, %v2019_v6  ;;  %v2245_v22 = vmul.f32 %v4137_v12, %v2021_v54  ;;  %v2026_v46 = vmax.f32 %v1437_v51, 0.0  ;;  %v2028_v16 = vmax.f32 %v1598_v8, 0.0 }
 0x21d   : > { %v2334_v15 = vadd.f32 %v2333_v26, %v2242_v25  ;;  %v2376_v1 = vadd.f32 %v2375_v11, %v2244_v42  ;;  %v1439_v61 = vadd.f32 %v1438_v7, %v4119_v35  ;;  %v1600_v45 = vadd.f32 %v1599_v36, %v4119_v35  ;;  %v1442_v58 = vpop.f32.mrf.mxu0  ;;  %v1603_v29 = vpop.f32.mrf.mxu1 }
 0x21e   : > { %v2355_v43 = vadd.f32 %v2354_v40, %v2243_v48  ;;  %v2397_v62 = vadd.f32 %v2396_v23, %v2245_v22  ;;  %v2250_v28 = vmul.f32 %v4153_v55, %v2026_v46  ;;  %v2252_v53 = vmul.f32 %v4153_v55, %v2028_v16  ;;  %v4185_v7 = vpop.permute.xlu0 %1306  ;;  %v4187_v36 = vpop.permute.xlu1 %2164 }
 0x21f   : > { %v2027_v5 = vmax.f32 %v1439_v61, 0.0  ;;  %v2029_v41 = vmax.f32 %v1600_v45, 0.0  ;;  %v1443_v38 = vadd.f32 %v1442_v58, %v4135_v37  ;;  %v1604_v52 = vadd.f32 %v1603_v29, %v4135_v37  ;;  %v1444_v32 = vpop.f32.mrf.mxu0  ;;  %v1605_v10 = vpop.f32.mrf.mxu1 }
 0x220   : > { %v2335_v34 = vadd.f32 %v2334_v15, %v2250_v28  ;;  %v2377_v59 = vadd.f32 %v2376_v1, %v2252_v53  ;;  %v1445_v14 = vadd.f32 %v1444_v32, %v4135_v37  ;;  %v1606_v21 = vadd.f32 %v1605_v10, %v4135_v37 }
 0x221   : > { %v2251_v39 = vmul.f32 %v4153_v55, %v2027_v5  ;;  %v2253_v56 = vmul.f32 %v4153_v55, %v2029_v41  ;;  %v2034_v26 = vmax.f32 %v1443_v38, 0.0  ;;  %v2036_v11 = vmax.f32 %v1604_v52, 0.0  ;;  %v1448_v0 = vpop.f32.mrf.mxu0  ;;  %v1609_v2 = vpop.f32.mrf.mxu1 }
 0x222   : > { %v2035_v18 = vmax.f32 %v1445_v14, 0.0  ;;  %v2037_v31 = vmax.f32 %v1606_v21, 0.0  ;;  %v1449_v20 = vadd.f32 %v1448_v0, %v4151_v33  ;;  %v1610_v30 = vadd.f32 %v1609_v2, %v4151_v33 }
 0x223   : > { %v2356_v9 = vadd.f32 %v2355_v43, %v2251_v39  ;;  %v2398_v27 = vadd.f32 %v2397_v62, %v2253_v56  ;;  %v2258_v6 = vmul.f32 %v4169_v4, %v2034_v26  ;;  %v2260_v54 = vmul.f32 %v4169_v4, %v2036_v11  ;;  %v1450_v51 = vpop.f32.mrf.mxu0  ;;  %v1611_v8 = vpop.f32.mrf.mxu1 }
 0x224   : > { %v2259_v40 = vmul.f32 %v4169_v4, %v2035_v18  ;;  %v2261_v23 = vmul.f32 %v4169_v4, %v2037_v31  ;;  %v2042_v25 = vmax.f32 %v1449_v20, 0.0  ;;  %v2044_v42 = vmax.f32 %v1610_v30, 0.0  ;;  %v4199_v39 = vpop.permute.xlu0 %1311  ;;  %v4201_v56 = vpop.permute.xlu1 %2169 }
 0x225   : > { %v2336_v48 = vadd.f32 %v2335_v34, %v2258_v6  ;;  %v2378_v22 = vadd.f32 %v2377_v59, %v2260_v54  ;;  %v1451_v46 = vadd.f32 %v1450_v51, %v4151_v33  ;;  %v1612_v16 = vadd.f32 %v1611_v8, %v4151_v33 }
 0x226   : > { %v2357_v15 = vadd.f32 %v2356_v9, %v2259_v40  ;;  %v2399_v1 = vadd.f32 %v2398_v27, %v2261_v23  ;;  %v2266_v61 = vmul.f32 %v4187_v36, %v2042_v25  ;;  %v2268_v45 = vmul.f32 %v4187_v36, %v2044_v42 }
 0x227   : > { %v2043_v58 = vmax.f32 %v1451_v46, 0.0  ;;  %v2045_v29 = vmax.f32 %v1612_v16, 0.0  ;;  %v1454_v43 = vpop.f32.mrf.mxu0  ;;  %v1615_v62 = vpop.f32.mrf.mxu1 }
 0x228   : > { %v2337_v28 = vadd.f32 %v2336_v48, %v2266_v61  ;;  %v2379_v53 = vadd.f32 %v2378_v22, %v2268_v45  ;;  %v1455_v5 = vadd.f32 %v1454_v43, %v4167_v50  ;;  %v1616_v41 = vadd.f32 %v1615_v62, %v4167_v50  ;;  %v4211_v46 = vpop.permute.xlu0 %1316  ;;  %v4213_v16 = vpop.permute.xlu1 %2174 }
 0x229   : > { %v2267_v38 = vmul.f32 %v4187_v36, %v2043_v58  ;;  %v2269_v52 = vmul.f32 %v4187_v36, %v2045_v29  ;;  %v1456_v32 = vpop.f32.mrf.mxu0  ;;  %v1617_v10 = vpop.f32.mrf.mxu1 }
 0x22a   : > { %v2050_v34 = vmax.f32 %v1455_v5, 0.0  ;;  %v2052_v59 = vmax.f32 %v1616_v41, 0.0  ;;  %v1457_v14 = vadd.f32 %v1456_v32, %v4167_v50  ;;  %v1618_v21 = vadd.f32 %v1617_v10, %v4167_v50 }
 0x22b   : > { %v2358_v26 = vadd.f32 %v2357_v15, %v2267_v38  ;;  %v2400_v11 = vadd.f32 %v2399_v1, %v2269_v52 }
 0x22c   : > { %v2274_v0 = vmul.f32 %v4201_v56, %v2050_v34  ;;  %v2276_v2 = vmul.f32 %v4201_v56, %v2052_v59  ;;  %v2051_v18 = vmax.f32 %v1457_v14, 0.0  ;;  %v2053_v31 = vmax.f32 %v1618_v21, 0.0 }
 0x22d   : > { %v1460_v20 = vpop.f32.mrf.mxu0  ;;  %v1621_v30 = vpop.f32.mrf.mxu1 }
 0x22e   : > { %v2338_v9 = vadd.f32 %v2337_v28, %v2274_v0  ;;  %v2380_v27 = vadd.f32 %v2379_v53, %v2276_v2  ;;  %v2275_v6 = vmul.f32 %v4201_v56, %v2051_v18  ;;  %v2277_v54 = vmul.f32 %v4201_v56, %v2053_v31 }
 0x22f   : > { %v1461_v51 = vadd.f32 %v1460_v20, %v4185_v7  ;;  %v1622_v8 = vadd.f32 %v1621_v30, %v4185_v7  ;;  %v1462_v40 = vpop.f32.mrf.mxu0  ;;  %v1623_v23 = vpop.f32.mrf.mxu1 }
 0x230   : > { %v2359_v25 = vadd.f32 %v2358_v26, %v2275_v6  ;;  %v2401_v42 = vadd.f32 %v2400_v11, %v2277_v54  ;;  %v1463_v48 = vadd.f32 %v1462_v40, %v4185_v7  ;;  %v1624_v22 = vadd.f32 %v1623_v23, %v4185_v7  ;;  %v4221_v26 = vpop.permute.xlu0 %1321  ;;  %v4223_v11 = vpop.permute.xlu1 %2179 }
 0x231   : > { %v2058_v15 = vmax.f32 %v1461_v51, 0.0  ;;  %v2060_v1 = vmax.f32 %v1622_v8, 0.0 }
 0x232   : > { %v2059_v61 = vmax.f32 %v1463_v48, 0.0  ;;  %v2061_v45 = vmax.f32 %v1624_v22, 0.0 }
 0x233   : > { %v2282_v58 = vmul.f32 %v4213_v16, %v2058_v15  ;;  %v2284_v29 = vmul.f32 %v4213_v16, %v2060_v1  ;;  %v1466_v43 = vpop.f32.mrf.mxu0  ;;  %v1627_v62 = vpop.f32.mrf.mxu1 }
 0x234   : > { %v2283_v28 = vmul.f32 %v4213_v16, %v2059_v61  ;;  %v2285_v53 = vmul.f32 %v4213_v16, %v2061_v45  ;;  %v1467_v5 = vadd.f32 %v1466_v43, %v4199_v39  ;;  %v1628_v41 = vadd.f32 %v1627_v62, %v4199_v39  ;;  %v4235_v61 = vpop.permute.xlu0 %1326  ;;  %v4237_v45 = vpop.permute.xlu1 %2184 }
 0x235   : > { %v2339_v38 = vadd.f32 %v2338_v9, %v2282_v58  ;;  %v2381_v52 = vadd.f32 %v2380_v27, %v2284_v29  ;;  %v1468_v32 = vpop.f32.mrf.mxu0  ;;  %v1629_v10 = vpop.f32.mrf.mxu1 }
 0x236   : > { %v2360_v34 = vadd.f32 %v2359_v25, %v2283_v28  ;;  %v2402_v59 = vadd.f32 %v2401_v42, %v2285_v53  ;;  %v2066_v14 = vmax.f32 %v1467_v5, 0.0  ;;  %v2068_v21 = vmax.f32 %v1628_v41, 0.0 }
 0x237   : > { %v1469_v0 = vadd.f32 %v1468_v32, %v4199_v39  ;;  %v1630_v2 = vadd.f32 %v1629_v10, %v4199_v39 }
 0x238   : > { %v2290_v18 = vmul.f32 %v4223_v11, %v2066_v14  ;;  %v2292_v31 = vmul.f32 %v4223_v11, %v2068_v21 }
 0x239   : > { %v2067_v20 = vmax.f32 %v1469_v0, 0.0  ;;  %v2069_v30 = vmax.f32 %v1630_v2, 0.0  ;;  %v1472_v9 = vpop.f32.mrf.mxu0  ;;  %v1633_v27 = vpop.f32.mrf.mxu1 }
 0x23a   : > { %v2340_v6 = vadd.f32 %v2339_v38, %v2290_v18  ;;  %v2382_v54 = vadd.f32 %v2381_v52, %v2292_v31  ;;  %v1473_v51 = vadd.f32 %v1472_v9, %v4211_v46  ;;  %v1634_v8 = vadd.f32 %v1633_v27, %v4211_v46  ;;  %v4249_v27 = vpop.permute.xlu1 %2189 }
 0x23b   : > { %v2291_v40 = vmul.f32 %v4223_v11, %v2067_v20  ;;  %v2293_v23 = vmul.f32 %v4223_v11, %v2069_v30  ;;  %v1474_v25 = vpop.f32.mrf.mxu0  ;;  %v1635_v42 = vpop.f32.mrf.mxu1 }
 0x23c   : > { %v2074_v48 = vmax.f32 %v1473_v51, 0.0  ;;  %v2076_v22 = vmax.f32 %v1634_v8, 0.0  ;;  %v1475_v15 = vadd.f32 %v1474_v25, %v4211_v46  ;;  %v1636_v1 = vadd.f32 %v1635_v42, %v4211_v46  ;;  %v4247_v20 = vpop.permute.xlu0 %1331 }
 0x23d   : > { %v2361_v58 = vadd.f32 %v2360_v34, %v2291_v40  ;;  %v2403_v29 = vadd.f32 %v2402_v59, %v2293_v23  ;;  %4639 = vst [vmem:[#allocation13_spill] sm:$0xff] %v4247_v20 }
 0x23e   : > { %v2298_v43 = vmul.f32 %v4237_v45, %v2074_v48  ;;  %v2300_v62 = vmul.f32 %v4237_v45, %v2076_v22  ;;  %v2075_v28 = vmax.f32 %v1475_v15, 0.0  ;;  %v2077_v53 = vmax.f32 %v1636_v1, 0.0 }
 0x23f   : > { %v1478_v5 = vpop.f32.mrf.mxu0  ;;  %v1639_v41 = vpop.f32.mrf.mxu1 }
 0x240   : > { %v2341_v38 = vadd.f32 %v2340_v6, %v2298_v43  ;;  %v2383_v52 = vadd.f32 %v2382_v54, %v2300_v62  ;;  %v2299_v32 = vmul.f32 %v4237_v45, %v2075_v28  ;;  %v2301_v10 = vmul.f32 %v4237_v45, %v2077_v53 }
 0x241   : > { %v1479_v14 = vadd.f32 %v1478_v5, %v4221_v26  ;;  %v1640_v21 = vadd.f32 %v1639_v41, %v4221_v26  ;;  %v1480_v34 = vpop.f32.mrf.mxu0  ;;  %v1641_v59 = vpop.f32.mrf.mxu1 }
 0x242   : > { %v2362_v0 = vadd.f32 %v2361_v58, %v2299_v32  ;;  %v2404_v2 = vadd.f32 %v2403_v29, %v2301_v10  ;;  %v1481_v18 = vadd.f32 %v1480_v34, %v4221_v26  ;;  %v1642_v31 = vadd.f32 %v1641_v59, %v4221_v26  ;;  %v4257_v5 = vpop.permute.xlu0 %2194 }
 0x243   : > { %v2082_v30 = vmax.f32 %v1479_v14, 0.0  ;;  %v2084_v9 = vmax.f32 %v1640_v21, 0.0  ;;  %v2914_v59 = vmov 1966171168  }
 0x244   : > { %v2083_v6 = vmax.f32 %v1481_v18, 0.0  ;;  %v2085_v54 = vmax.f32 %v1642_v31, 0.0 }
 0x245   : > { %v2306_v51 = vmul.f32 %v4249_v27, %v2082_v30  ;;  %v2308_v8 = vmul.f32 %v4249_v27, %v2084_v9  ;;  %v1484_v40 = vpop.f32.mrf.mxu0  ;;  %v1645_v23 = vpop.f32.mrf.mxu1 }
 0x246   : > { %v2307_v25 = vmul.f32 %v4249_v27, %v2083_v6  ;;  %v2309_v42 = vmul.f32 %v4249_v27, %v2085_v54  ;;  %v1485_v48 = vadd.f32 %v1484_v40, %v4235_v61  ;;  %v1646_v22 = vadd.f32 %v1645_v23, %v4235_v61 }
 0x247   : > { %v2342_v15 = vadd.f32 %v2341_v38, %v2306_v51  ;;  %v2384_v1 = vadd.f32 %v2383_v52, %v2308_v8  ;;  %v1486_v58 = vpop.f32.mrf.mxu0  ;;  %v1647_v29 = vpop.f32.mrf.mxu1 }
 0x248   : > { %v2363_v43 = vadd.f32 %v2362_v0, %v2307_v25  ;;  %v2405_v62 = vadd.f32 %v2404_v2, %v2309_v42  ;;  %v2090_v28 = vmax.f32 %v1485_v48, 0.0  ;;  %v2092_v53 = vmax.f32 %v1646_v22, 0.0  ;;  %v4271_v48 = vpop.permute.xlu1 %2199 }
 0x249   : > { %v1487_v41 = vadd.f32 %v1486_v58, %v4235_v61  ;;  %v1648_v32 = vadd.f32 %v1647_v29, %v4235_v61  ;;  %v2569_v0 = vunpack.c.l.s4 %v2914_v59  ;;  %v2571_v2 = vlaneseq  ;;  %4640 = vst [vmem:[#allocation10_spill] sm:$0xff] %v4271_v48 }
 0x24a   : > { %v2314_v10 = vmul.f32 %v4257_v5, %v2090_v28  ;;  %v2316_v14 = vmul.f32 %v4257_v5, %v2092_v53 }
 0x24b   : > { %v2091_v21 = vmax.f32 %v1487_v41, 0.0  ;;  %v2093_v34 = vmax.f32 %v1648_v32, 0.0  ;;  %v1490_v38 = vpop.f32.mrf.mxu0  ;;  %v1651_v52 = vpop.f32.mrf.mxu1  ;;  %v2572_v58 = vshrl.u32 %v2571_v2, 7 }
 0x24c   : > { %v2343_v18 = vadd.f32 %v2342_v15, %v2314_v10  ;;  %v2385_v31 = vadd.f32 %v2384_v1, %v2316_v14  ;;  %v1491_v30 = vadd.f32 %v1490_v38, %v4247_v20  ;;  %v1652_v9 = vadd.f32 %v1651_v52, %v4247_v20 }
 0x24d   : > { %v2315_v6 = vmul.f32 %v4257_v5, %v2091_v21  ;;  %v2317_v54 = vmul.f32 %v4257_v5, %v2093_v34  ;;  %v1492_v51 = vpop.f32.mrf.mxu0  ;;  %v1653_v8 = vpop.f32.mrf.mxu1  ;;  %v2570_v1 = vunpack.c.0.s8 %v2569_v0  ;;  %v4278_v52 = vstv %s4263_s14 }
 0x24e   : > { %v2098_v40 = vmax.f32 %v1491_v30, 0.0  ;;  %v2100_v23 = vmax.f32 %v1652_v9, 0.0  ;;  %v1493_v25 = vadd.f32 %v1492_v51, %v4247_v20  ;;  %v1654_v42 = vadd.f32 %v1653_v8, %v4247_v20 }
 0x24f   : > { %v2364_v22 = vadd.f32 %v2363_v43, %v2315_v6  ;;  %v2406_v15 = vadd.f32 %v2405_v62, %v2317_v54  ;;  %v4282_v2 = vsub.s32 %v2570_v1, %v2572_v58 }
 0x250   : > { %v2322_v29 = vmul.f32 %v4271_v48, %v2098_v40  ;;  %v2324_v28 = vmul.f32 %v4271_v48, %v2100_v23  ;;  %v2099_v53 = vmax.f32 %v1493_v25, 0.0  ;;  %v2101_v41 = vmax.f32 %v1654_v42, 0.0 }
 0x251   : > { %v1722_v32 = vpop.f32.mrf.mxu0  ;;  %v1883_v10 = vpop.f32.mrf.mxu1  ;;  %4641 = vst [vmem:[#allocation11_spill] sm:$0xff] %v4282_v2 }
 0x252   : > { %v2344_v14 = vadd.f32 %v2343_v18, %v2322_v29  ;;  %v2386_v21 = vadd.f32 %v2385_v31, %v2324_v28  ;;  %v2323_v34 = vmul.f32 %v4271_v48, %v2099_v53  ;;  %v2325_v38 = vmul.f32 %v4271_v48, %v2101_v41 }
 0x253   : > { %v1723_v43 = vadd.f32 %v1722_v32, %v4083_v24  ;;  %v1884_v62 = vadd.f32 %v1883_v10, %v4083_v24  ;;  %v1724_v59 = vpop.f32.mrf.mxu0  ;;  %v1885_v0 = vpop.f32.mrf.mxu1 }
 0x254   : > { %v2345_v30 = vrot.slane %v2344_v14, 4  ;;  %v2387_v9 = vrot.slane %v2386_v21, 4  ;;  %v2365_v6 = vadd.f32 %v2364_v22, %v2323_v34  ;;  %v2407_v54 = vadd.f32 %v2406_v15, %v2325_v38 }
 0x255   : > { %v1982_v18 = vmax.f32 %v1723_v43, 0.0  ;;  %v1984_v31 = vmax.f32 %v1884_v62, 0.0  ;;  %v1725_v51 = vadd.f32 %v1724_v59, %v4083_v24  ;;  %v1886_v8 = vadd.f32 %v1885_v0, %v4083_v24  ;;  %v1728_v40 = vpop.f32.mrf.mxu0  ;;  %v1889_v23 = vpop.f32.mrf.mxu1 }
 0x256   : > { %v2346_v25 = vadd.f32 %v2345_v30, %v2344_v14  ;;  %v2388_v42 = vadd.f32 %v2387_v9, %v2386_v21  ;;  %v2366_v29 = vrot.slane %v2365_v6, 4  ;;  %v2408_v28 = vrot.slane %v2407_v54, 4 }
 0x257   : > { %v2206_v53 = vmul.f32 %v4091_v60, %v1982_v18  ;;  %v2208_v1 = vmul.f32 %v4091_v60, %v1984_v31  ;;  %v1983_v58 = vmax.f32 %v1725_v51, 0.0  ;;  %v1985_v41 = vmax.f32 %v1886_v8, 0.0  ;;  %v1730_v22 = vpop.f32.mrf.mxu0  ;;  %v1891_v15 = vpop.f32.mrf.mxu1 }
 0x258   : > { %v2347_v32 = vrot.slane %v2346_v25, 2  ;;  %v2389_v10 = vrot.slane %v2388_v42, 2  ;;  %v2367_v34 = vadd.f32 %v2366_v29, %v2365_v6  ;;  %v2409_v38 = vadd.f32 %v2408_v28, %v2407_v54 }
 0x259   : > { %v2207_v24 = vmul.f32 %v4091_v60, %v1983_v58  ;;  %v2209_v43 = vmul.f32 %v4091_v60, %v1985_v41  ;;  %v1729_v14 = vadd.f32 %v1728_v40, %v4085_v57  ;;  %v1890_v21 = vadd.f32 %v1889_v23, %v4085_v57  ;;  %v1734_v62 = vpop.f32.mrf.mxu0  ;;  %v1895_v59 = vpop.f32.mrf.mxu1 }
 0x25a   : > { %v2348_v0 = vadd.f32 %v2347_v32, %v2346_v25  ;;  %v2390_v30 = vadd.f32 %v2389_v10, %v2388_v42  ;;  %v2368_v9 = vrot.slane %v2367_v34, 2  ;;  %v2410_v18 = vrot.slane %v2409_v38, 2 }
 0x25b   : > { %v1990_v31 = vmax.f32 %v1729_v14, 0.0  ;;  %v1992_v51 = vmax.f32 %v1890_v21, 0.0  ;;  %v1731_v8 = vadd.f32 %v1730_v22, %v4085_v57  ;;  %v1892_v6 = vadd.f32 %v1891_v15, %v4085_v57  ;;  %v1736_v54 = vpop.f32.mrf.mxu0  ;;  %v1897_v29 = vpop.f32.mrf.mxu1 }
 0x25c   : > { %v2349_v28 = vrot.slane %v2348_v0, 1  ;;  %v2391_v60 = vrot.slane %v2390_v30, 1  ;;  %v2369_v58 = vadd.f32 %v2368_v9, %v2367_v34  ;;  %v2411_v40 = vadd.f32 %v2410_v18, %v2409_v38 }
 0x25d   : > { %v2214_v23 = vmul.f32 %v4093_v44, %v1990_v31  ;;  %v2216_v41 = vmul.f32 %v4093_v44, %v1992_v51  ;;  %v1991_v25 = vmax.f32 %v1731_v8, 0.0  ;;  %v1993_v42 = vmax.f32 %v1892_v6, 0.0  ;;  %v1740_v32 = vpop.f32.mrf.mxu0  ;;  %v1901_v10 = vpop.f32.mrf.mxu1 }
 0x25e   : > { %v2350_v14 = vadd.f32 %v2349_v28, %v2348_v0  ;;  %v2392_v21 = vadd.f32 %v2391_v60, %v2390_v30  ;;  %v2370_v2 = vrot.slane %v2369_v58, 1  ;;  %v2412_v22 = vrot.slane %v2411_v40, 1 }
 0x25f   : > { %v2414_v48 = vadd.f32 %v2214_v23, %v2206_v53  ;;  %v2456_v57 = vadd.f32 %v2216_v41, %v2208_v1  ;;  %v2215_v15 = vmul.f32 %v4093_v44, %v1991_v25  ;;  %v2217_v20 = vmul.f32 %v4093_v44, %v1993_v42  ;;  %v1742_v34 = vpop.f32.mrf.mxu0  ;;  %v1903_v38 = vpop.f32.mrf.mxu1 }
 0x260   : > { %v2500_v9 = vadd.f32 %v4278_v52, %v2350_v14  ;;  %v2502_v18 = vadd.f32 %v4278_v52, %v2392_v21  ;;  %v2371_v31 = vadd.f32 %v2370_v2, %v2369_v58  ;;  %v2413_v51 = vadd.f32 %v2412_v22, %v2411_v40 }
 0x261   : > { %v2435_v8 = vadd.f32 %v2215_v15, %v2207_v24  ;;  %v2477_v6 = vadd.f32 %v2217_v20, %v2209_v43  ;;  %v1735_v0 = vadd.f32 %v1734_v62, %v4087_v19  ;;  %v1896_v30 = vadd.f32 %v1895_v59, %v4087_v19  ;;  %v1746_v53 = vpop.f32.mrf.mxu0  ;;  %v1907_v1 = vpop.f32.mrf.mxu1 }
 0x262   : > { %v2760_v28 = vmul.f32 -1.442695, %v2500_v9  ;;  %v2762_v60 = vmul.f32 -1.442695, %v2502_v18  ;;  %v2501_v44 = vadd.f32 %v4278_v52, %v2371_v31  ;;  %v2503_v23 = vadd.f32 %v4278_v52, %v2413_v51 }
 0x263   : > { %v1998_v41 = vmax.f32 %v1735_v0, 0.0  ;;  %v2000_v25 = vmax.f32 %v1896_v30, 0.0  ;;  %v1737_v42 = vadd.f32 %v1736_v54, %v4087_v19  ;;  %v1898_v2 = vadd.f32 %v1897_v29, %v4087_v19  ;;  %v1748_v24 = vpop.f32.mrf.mxu0  ;;  %v1909_v20 = vpop.f32.mrf.mxu1 }
 0x264   : > { %2818 = vpow2.f32 %v2760_v28  ;;  %v2761_v43 = vmul.f32 -1.442695, %v2501_v44  ;;  %v2763_v62 = vmul.f32 -1.442695, %v2503_v23  ;;  %v1741_v59 = vadd.f32 %v1740_v32, %v4089_v3 }
 0x265   : > { %2820 = vpow2.f32 %v2762_v60  ;;  %v2222_v58 = vmul.f32 %v4097_v17, %v1998_v41  ;;  %v2224_v40 = vmul.f32 %v4097_v17, %v2000_v25  ;;  %v1999_v14 = vmax.f32 %v1737_v42, 0.0  ;;  %v1752_v21 = vpop.f32.mrf.mxu0  ;;  %v1913_v22 = vpop.f32.mrf.mxu1 }
 0x266   : > { %2822 = vpow2.f32 %v2761_v43  ;;  %v2001_v15 = vmax.f32 %v1898_v2, 0.0  ;;  %v2006_v54 = vmax.f32 %v1741_v59, 0.0  ;;  %v1902_v19 = vadd.f32 %v1901_v10, %v4089_v3 }
 0x267   : > { %2824 = vpow2.f32 %v2763_v62  ;;  %v2415_v29 = vadd.f32 %v2414_v48, %v2222_v58  ;;  %v2457_v9 = vadd.f32 %v2456_v57, %v2224_v40  ;;  %v2223_v18 = vmul.f32 %v4097_v17, %v1999_v14  ;;  %v1754_v31 = vpop.f32.mrf.mxu0  ;;  %v1915_v32 = vpop.f32.mrf.mxu1 }
 0x268   : > { %v2225_v51 = vmul.f32 %v4097_v17, %v2001_v15  ;;  %v2230_v0 = vmul.f32 %v4105_v63, %v2006_v54  ;;  %v2008_v30 = vmax.f32 %v1902_v19, 0.0  ;;  %v1743_v28 = vadd.f32 %v1742_v34, %v4089_v3 }
 0x269   : > { %v2436_v60 = vadd.f32 %v2435_v8, %v2223_v18  ;;  %v1904_v44 = vadd.f32 %v1903_v38, %v4089_v3  ;;  %v1747_v23 = vadd.f32 %v1746_v53, %v4095_v47  ;;  %v1908_v10 = vadd.f32 %v1907_v1, %v4095_v47  ;;  %v1758_v48 = vpop.f32.mrf.mxu0  ;;  %v1919_v57 = vpop.f32.mrf.mxu1 }
 0x26a   : > { %v2478_v41 = vadd.f32 %v2477_v6, %v2225_v51  ;;  %v2416_v25 = vadd.f32 %v2415_v29, %v2230_v0  ;;  %v2232_v42 = vmul.f32 %v4105_v63, %v2008_v30  ;;  %v2007_v2 = vmax.f32 %v1743_v28, 0.0 }
 0x26b   : > { %v2009_v17 = vmax.f32 %v1904_v44, 0.0  ;;  %v2014_v43 = vmax.f32 %v1747_v23, 0.0  ;;  %v2016_v62 = vmax.f32 %v1908_v10, 0.0  ;;  %v1749_v59 = vadd.f32 %v1748_v24, %v4095_v47  ;;  %v1760_v34 = vpop.f32.mrf.mxu0  ;;  %v1921_v8 = vpop.f32.mrf.mxu1 }
 0x26c   : > { %v2458_v58 = vadd.f32 %v2457_v9, %v2232_v42  ;;  %v2231_v3 = vmul.f32 %v4105_v63, %v2007_v2  ;;  %v1910_v38 = vadd.f32 %v1909_v20, %v4095_v47  ;;  %v1753_v53 = vadd.f32 %v1752_v21, %v4103_v13 }
 0x26d   : > { %v2233_v6 = vmul.f32 %v4105_v63, %v2009_v17  ;;  %v2238_v1 = vmul.f32 %v4121_v49, %v2014_v43  ;;  %v2240_v40 = vmul.f32 %v4121_v49, %v2016_v62  ;;  %v2015_v14 = vmax.f32 %v1749_v59, 0.0  ;;  %v1764_v15 = vpop.f32.mrf.mxu0  ;;  %v1925_v54 = vpop.f32.mrf.mxu1 }
 0x26e   : > { %v2437_v19 = vadd.f32 %v2436_v60, %v2231_v3  ;;  %v2017_v24 = vmax.f32 %v1910_v38, 0.0  ;;  %v2022_v29 = vmax.f32 %v1753_v53, 0.0  ;;  %v1914_v9 = vadd.f32 %v1913_v22, %v4103_v13 }
 0x26f   : > { %v2479_v18 = vadd.f32 %v2478_v41, %v2233_v6  ;;  %v2417_v51 = vadd.f32 %v2416_v25, %v2238_v1  ;;  %v2459_v0 = vadd.f32 %v2458_v58, %v2240_v40  ;;  %v2239_v47 = vmul.f32 %v4121_v49, %v2015_v14  ;;  %v1766_v20 = vpop.f32.mrf.mxu0  ;;  %v1927_v21 = vpop.f32.mrf.mxu1 }
 0x270   : > { %v2241_v63 = vmul.f32 %v4121_v49, %v2017_v24  ;;  %v2246_v30 = vmul.f32 %v4137_v12, %v2022_v29  ;;  %v2024_v28 = vmax.f32 %v1914_v9, 0.0  ;;  %v1755_v44 = vadd.f32 %v1754_v31, %v4103_v13 }
 0x271   : > { %v2819_v23 = vpop.eup %2818  ;;  %v2438_v60 = vadd.f32 %v2437_v19, %v2239_v47  ;;  %v1916_v10 = vadd.f32 %v1915_v32, %v4103_v13  ;;  %v1759_v22 = vadd.f32 %v1758_v48, %v4119_v35  ;;  %v1920_v41 = vadd.f32 %v1919_v57, %v4119_v35  ;;  %v1770_v25 = vpop.f32.mrf.mxu0 }
 0x272   : > { %v1931_v42 = vpop.f32.mrf.mxu1  ;;  %v2821_v2 = vpop.eup %2820  ;;  %v2532_v17 = vadd.f32 1.0, %v2819_v23  ;;  %v2480_v43 = vadd.f32 %v2479_v18, %v2241_v63  ;;  %v2418_v62 = vadd.f32 %v2417_v51, %v2246_v30  ;;  %v2248_v49 = vmul.f32 %v4137_v12, %v2024_v28 }
 0x273   : > { %v2823_v59 = vpop.eup %2822  ;;  %v2534_v58 = vadd.f32 1.0, %v2821_v2  ;;  %v2023_v3 = vmax.f32 %v1755_v44, 0.0  ;;  %v2025_v31 = vmax.f32 %v1916_v10, 0.0  ;;  %v2030_v38 = vmax.f32 %v1759_v22, 0.0  ;;  %v1772_v53 = vpop.f32.mrf.mxu0 }
 0x274   : > { %v1933_v6 = vpop.f32.mrf.mxu1  ;;  %v2825_v13 = vpop.eup %2824  ;;  %2826 = vrcp.f32 %v2532_v17  ;;  %v2533_v32 = vadd.f32 1.0, %v2823_v59  ;;  %v2460_v48 = vadd.f32 %v2459_v0, %v2248_v49  ;;  %v2032_v57 = vmax.f32 %v1920_v41, 0.0 }
 0x275   : > { %2828 = vrcp.f32 %v2534_v58  ;;  %v2535_v1 = vadd.f32 1.0, %v2825_v13  ;;  %v2247_v40 = vmul.f32 %v4137_v12, %v2023_v3  ;;  %v2249_v14 = vmul.f32 %v4137_v12, %v2025_v31  ;;  %v1776_v19 = vpop.f32.mrf.mxu0 }
 0x276   : > { %v1937_v24 = vpop.f32.mrf.mxu1  ;;  %2830 = vrcp.f32 %v2533_v32  ;;  %v2254_v29 = vmul.f32 %v4153_v55, %v2030_v38  ;;  %v2256_v9 = vmul.f32 %v4153_v55, %v2032_v57  ;;  %v1761_v18 = vadd.f32 %v1760_v34, %v4119_v35 }
 0x277   : > { %2832 = vrcp.f32 %v2535_v1  ;;  %v2439_v51 = vadd.f32 %v2438_v60, %v2247_v40  ;;  %v2481_v47 = vadd.f32 %v2480_v43, %v2249_v14  ;;  %v1922_v0 = vadd.f32 %v1921_v8, %v4119_v35  ;;  %v1778_v63 = vpop.f32.mrf.mxu0 }
 0x278   : > { %v1939_v30 = vpop.f32.mrf.mxu1  ;;  %v2419_v28 = vadd.f32 %v2418_v62, %v2254_v29  ;;  %v2461_v44 = vadd.f32 %v2460_v48, %v2256_v9  ;;  %v2031_v23 = vmax.f32 %v1761_v18, 0.0  ;;  %v1765_v12 = vadd.f32 %v1764_v15, %v4135_v37 }
 0x279   : > { %v2033_v10 = vmax.f32 %v1922_v0, 0.0  ;;  %v1926_v22 = vadd.f32 %v1925_v54, %v4135_v37  ;;  %v1767_v41 = vadd.f32 %v1766_v20, %v4135_v37  ;;  %v1928_v2 = vadd.f32 %v1927_v21, %v4135_v37  ;;  %v1782_v34 = vpop.f32.mrf.mxu0 }
 0x27a   : > { %v1943_v17 = vpop.f32.mrf.mxu1  ;;  %v2255_v60 = vmul.f32 %v4153_v55, %v2031_v23  ;;  %v2038_v43 = vmax.f32 %v1765_v12, 0.0  ;;  %v1771_v35 = vadd.f32 %v1770_v25, %v4151_v33  ;;  %v1932_v8 = vadd.f32 %v1931_v42, %v4151_v33 }
 0x27b   : > { %v2257_v62 = vmul.f32 %v4153_v55, %v2033_v10  ;;  %v2040_v49 = vmax.f32 %v1926_v22, 0.0  ;;  %v2039_v15 = vmax.f32 %v1767_v41, 0.0  ;;  %v2041_v59 = vmax.f32 %v1928_v2, 0.0  ;;  %v1784_v58 = vpop.f32.mrf.mxu0 }
 0x27c   : > { %v1945_v54 = vpop.f32.mrf.mxu1  ;;  %v2440_v3 = vadd.f32 %v2439_v51, %v2255_v60  ;;  %v2262_v20 = vmul.f32 %v4169_v4, %v2038_v43  ;;  %v2046_v37 = vmax.f32 %v1771_v35, 0.0  ;;  %v2048_v21 = vmax.f32 %v1932_v8, 0.0 }
 0x27d   : > { %v2482_v31 = vadd.f32 %v2481_v47, %v2257_v62  ;;  %v2264_v38 = vmul.f32 %v4169_v4, %v2040_v49  ;;  %v2263_v13 = vmul.f32 %v4169_v4, %v2039_v15  ;;  %v2265_v25 = vmul.f32 %v4169_v4, %v2041_v59  ;;  %v1788_v42 = vpop.f32.mrf.mxu0 }
 0x27e   : > { %v1949_v32 = vpop.f32.mrf.mxu1  ;;  %v2420_v55 = vadd.f32 %v2419_v28, %v2262_v20  ;;  %v2270_v48 = vmul.f32 %v4187_v36, %v2046_v37  ;;  %v2272_v57 = vmul.f32 %v4187_v36, %v2048_v21  ;;  %v1773_v1 = vadd.f32 %v1772_v53, %v4151_v33 }
 0x27f   : > { %v2462_v40 = vadd.f32 %v2461_v44, %v2264_v38  ;;  %v2441_v14 = vadd.f32 %v2440_v3, %v2263_v13  ;;  %v2483_v29 = vadd.f32 %v2482_v31, %v2265_v25  ;;  %v1934_v9 = vadd.f32 %v1933_v6, %v4151_v33  ;;  %v1790_v18 = vpop.f32.mrf.mxu0 }
 0x280   : > { %v1951_v51 = vpop.f32.mrf.mxu1  ;;  %v2421_v47 = vadd.f32 %v2420_v55, %v2270_v48  ;;  %v2047_v0 = vmax.f32 %v1773_v1, 0.0  ;;  %v1777_v4 = vadd.f32 %v1776_v19, %v4167_v50  ;;  %v1938_v23 = vadd.f32 %v1937_v24, %v4167_v50 }
 0x281   : > { %v4358_v28 = vpop.eup %2826  ;;  %v2463_v12 = vadd.f32 %v2462_v40, %v2272_v57  ;;  %v2049_v10 = vmax.f32 %v1934_v9, 0.0  ;;  %v1779_v22 = vadd.f32 %v1778_v63, %v4167_v50  ;;  %v1940_v53 = vadd.f32 %v1939_v30, %v4167_v50  ;;  %v1794_v44 = vpop.f32.mrf.mxu0 }
 0x282   : > { %v1955_v41 = vpop.f32.mrf.mxu1  ;;  %v4362_v2 = vpop.eup %2828  ;;  %v2271_v33 = vmul.f32 %v4187_v36, %v2047_v0  ;;  %v2054_v6 = vmax.f32 %v1777_v4, 0.0  ;;  %v2056_v60 = vmax.f32 %v1938_v23, 0.0  ;;  %v1783_v19 = vadd.f32 %v1782_v34, %v4185_v7 }
 0x283   : > { %v4366_v43 = vpop.eup %2830  ;;  %v2273_v24 = vmul.f32 %v4187_v36, %v2049_v10  ;;  %v2055_v35 = vmax.f32 %v1779_v22, 0.0  ;;  %v2057_v8 = vmax.f32 %v1940_v53, 0.0  ;;  %v1944_v63 = vadd.f32 %v1943_v17, %v4185_v7  ;;  %v1796_v62 = vpop.f32.mrf.mxu0 }
 0x284   : > { %v1957_v50 = vpop.f32.mrf.mxu1  ;;  %v4370_v30 = vpop.eup %2832  ;;  %v2442_v49 = vadd.f32 %v2441_v14, %v2271_v33  ;;  %v2278_v15 = vmul.f32 %v4201_v56, %v2054_v6  ;;  %v2280_v59 = vmul.f32 %v4201_v56, %v2056_v60  ;;  %v2062_v3 = vmax.f32 %v1783_v19, 0.0 }
 0x285   : > { %v2484_v20 = vadd.f32 %v2483_v29, %v2273_v24  ;;  %v2279_v34 = vmul.f32 %v4201_v56, %v2055_v35  ;;  %v2281_v37 = vmul.f32 %v4201_v56, %v2057_v8  ;;  %v2064_v36 = vmax.f32 %v1944_v63, 0.0  ;;  %v1800_v21 = vpop.f32.mrf.mxu0 }
 0x286   : > { %v1961_v31 = vpop.f32.mrf.mxu1  ;;  %v2422_v38 = vadd.f32 %v2421_v47, %v2278_v15  ;;  %v2464_v17 = vadd.f32 %v2463_v12, %v2280_v59  ;;  %v2286_v13 = vmul.f32 %v4213_v16, %v2062_v3  ;;  %v1785_v25 = vadd.f32 %v1784_v58, %v4185_v7 }
 0x287   : > { %v2443_v55 = vadd.f32 %v2442_v49, %v2279_v34  ;;  %v2485_v48 = vadd.f32 %v2484_v20, %v2281_v37  ;;  %v2288_v57 = vmul.f32 %v4213_v16, %v2064_v36  ;;  %v1946_v1 = vadd.f32 %v1945_v54, %v4185_v7  ;;  %v1802_v40 = vpop.f32.mrf.mxu0 }
 0x288   : > { %v1963_v14 = vpop.f32.mrf.mxu1  ;;  %v2423_v29 = vadd.f32 %v2422_v38, %v2286_v13  ;;  %v2063_v9 = vmax.f32 %v1785_v25, 0.0  ;;  %v1789_v56 = vadd.f32 %v1788_v42, %v4199_v39  ;;  %v1950_v0 = vadd.f32 %v1949_v32, %v4199_v39 }
 0x289   : > { %v2465_v47 = vadd.f32 %v2464_v17, %v2288_v57  ;;  %v2065_v4 = vmax.f32 %v1946_v1, 0.0  ;;  %v1791_v23 = vadd.f32 %v1790_v18, %v4199_v39  ;;  %v1952_v58 = vadd.f32 %v1951_v51, %v4199_v39  ;;  %v1806_v54 = vpop.f32.mrf.mxu0 }
 0x28a   : > { %v2287_v12 = vmul.f32 %v4213_v16, %v2063_v9  ;;  %v2070_v10 = vmax.f32 %v1789_v56, 0.0  ;;  %v2072_v22 = vmax.f32 %v1950_v0, 0.0  ;;  %v1795_v7 = vadd.f32 %v1794_v44, %v4211_v46  ;;  %v1967_v53 = vpop.f32.mrf.mxu1 }
 0x28b   : > { %v2289_v33 = vmul.f32 %v4213_v16, %v2065_v4  ;;  %v2071_v6 = vmax.f32 %v1791_v23, 0.0  ;;  %v2073_v42 = vmax.f32 %v1952_v58, 0.0  ;;  %v1956_v32 = vadd.f32 %v1955_v41, %v4211_v46  ;;  %v1808_v15 = vpop.f32.mrf.mxu0 }
 0x28c   : > { %v2444_v60 = vadd.f32 %v2443_v55, %v2287_v12  ;;  %v2294_v19 = vmul.f32 %v4223_v11, %v2070_v10  ;;  %v2296_v18 = vmul.f32 %v4223_v11, %v2072_v22  ;;  %v2078_v39 = vmax.f32 %v1795_v7, 0.0  ;;  %v1969_v41 = vpop.f32.mrf.mxu1 }
 0x28d   : > { %v2486_v51 = vadd.f32 %v2485_v48, %v2289_v33  ;;  %v2295_v24 = vmul.f32 %v4223_v11, %v2071_v6  ;;  %v2297_v35 = vmul.f32 %v4223_v11, %v2073_v42  ;;  %v2080_v44 = vmax.f32 %v1956_v32, 0.0 }
 0x28e   : > { %v2424_v8 = vadd.f32 %v2423_v29, %v2294_v19  ;;  %v2466_v63 = vadd.f32 %v2465_v47, %v2296_v18  ;;  %v2302_v16 = vmul.f32 %v4237_v45, %v2078_v39  ;;  %v1797_v49 = vadd.f32 %v1796_v62, %v4211_v46  ;;  %v1812_v29 = vpop.f32.mrf.mxu0 }
 0x28f   : > { %v2445_v59 = vadd.f32 %v2444_v60, %v2295_v24  ;;  %v2487_v3 = vadd.f32 %v2486_v51, %v2297_v35  ;;  %v2304_v20 = vmul.f32 %v4237_v45, %v2080_v44  ;;  %v1958_v34 = vadd.f32 %v1957_v50, %v4211_v46  ;;  %v1973_v46 = vpop.f32.mrf.mxu1  ;;  %v4642_v60 = vld [vmem:[#allocation13_spill] sm:$0xff] }
 0x290   : > { %v2425_v37 = vadd.f32 %v2424_v8, %v2302_v16  ;;  %v2079_v36 = vmax.f32 %v1797_v49, 0.0  ;;  %v1801_v38 = vadd.f32 %v1800_v21, %v4221_v26  ;;  %v1962_v11 = vadd.f32 %v1961_v31, %v4221_v26  ;;  %v1814_v22 = vpop.f32.mrf.mxu0 }
 0x291   : > { %v2467_v17 = vadd.f32 %v2466_v63, %v2304_v20  ;;  %v2081_v13 = vmax.f32 %v1958_v34, 0.0  ;;  %v1803_v25 = vadd.f32 %v1802_v40, %v4221_v26  ;;  %v1964_v62 = vadd.f32 %v1963_v14, %v4221_v26  ;;  %v1975_v7 = vpop.f32.mrf.mxu1  ;;  %v4644_v34 = vld [vmem:[#allocation11_spill] sm:$0xff] }
 0x292   : > { %v2303_v55 = vmul.f32 %v4237_v45, %v2079_v36  ;;  %v2086_v48 = vmax.f32 %v1801_v38, 0.0  ;;  %v2088_v57 = vmax.f32 %v1962_v11, 0.0  ;;  %v1807_v1 = vadd.f32 %v1806_v54, %v4235_v61 }
 0x293   : > { %v2305_v50 = vmul.f32 %v4237_v45, %v2081_v13  ;;  %v2087_v9 = vmax.f32 %v1803_v25, 0.0  ;;  %v2089_v21 = vmax.f32 %v1964_v62, 0.0  ;;  %v1968_v31 = vadd.f32 %v1967_v53, %v4235_v61 }
 0x294   : > { %v2446_v56 = vadd.f32 %v2445_v59, %v2303_v55  ;;  %v2310_v0 = vmul.f32 %v4249_v27, %v2086_v48  ;;  %v2312_v40 = vmul.f32 %v4249_v27, %v2088_v57  ;;  %v2094_v26 = vmax.f32 %v1807_v1, 0.0  ;;  %v4643_v59 = vld [vmem:[#allocation10_spill] sm:$0xff] }
 0x295   : > { %v2488_v14 = vadd.f32 %v2487_v3, %v2305_v50  ;;  %v2311_v47 = vmul.f32 %v4249_v27, %v2087_v9  ;;  %v2313_v4 = vmul.f32 %v4249_v27, %v2089_v21  ;;  %v2096_v23 = vmax.f32 %v1968_v31, 0.0 }
 0x296   : > { %v2426_v58 = vadd.f32 %v2425_v37, %v2310_v0  ;;  %v2468_v12 = vadd.f32 %v2467_v17, %v2312_v40  ;;  %v2318_v45 = vmul.f32 %v4257_v5, %v2094_v26  ;;  %v1809_v10 = vadd.f32 %v1808_v15, %v4235_v61 }
 0x297   : > { %v2447_v54 = vadd.f32 %v2446_v56, %v2311_v47  ;;  %v2489_v53 = vadd.f32 %v2488_v14, %v2313_v4  ;;  %v2320_v33 = vmul.f32 %v4257_v5, %v2096_v23  ;;  %v1970_v6 = vadd.f32 %v1969_v41, %v4235_v61 }
 0x298   : > { %v2427_v42 = vadd.f32 %v2426_v58, %v2318_v45  ;;  %v2095_v32 = vmax.f32 %v1809_v10, 0.0  ;;  %v1813_v19 = vadd.f32 %v1812_v29, %v4642_v60  ;;  %v1974_v27 = vadd.f32 %v1973_v46, %v4642_v60 }
 0x299   : > { %v2469_v18 = vadd.f32 %v2468_v12, %v2320_v33  ;;  %v2097_v39 = vmax.f32 %v1970_v6, 0.0  ;;  %v1815_v51 = vadd.f32 %v1814_v22, %v4642_v60  ;;  %v1976_v24 = vadd.f32 %v1975_v7, %v4642_v60 }
 0x29a   : > { %v2319_v35 = vmul.f32 %v4257_v5, %v2095_v32  ;;  %v2102_v44 = vmax.f32 %v1813_v19, 0.0  ;;  %v2104_v8 = vmax.f32 %v1974_v27, 0.0  ;;  %v2564_v63 = vcombine.low %v4358_v28, %v4366_v43 }
 0x29b   : > { %v2321_v61 = vmul.f32 %v4257_v5, %v2097_v39  ;;  %v2103_v16 = vmax.f32 %v1815_v51, 0.0  ;;  %v2105_v49 = vmax.f32 %v1976_v24, 0.0  ;;  %v2565_v15 = vcombine.low %v4362_v2, %v4370_v30 }
 0x29c   : > { %v2448_v41 = vadd.f32 %v2447_v54, %v2319_v35  ;;  %v2326_v3 = vmul.f32 %v4643_v59, %v2102_v44  ;;  %v2328_v20 = vmul.f32 %v4643_v59, %v2104_v8  ;;  %v4425_v37 = vrot.slane %v2564_v63, %v4644_v34 }
 0x29d   : > { %v2490_v36 = vadd.f32 %v2489_v53, %v2321_v61  ;;  %v2327_v38 = vmul.f32 %v4643_v59, %v2103_v16  ;;  %v2329_v28 = vmul.f32 %v4643_v59, %v2105_v49  ;;  %v4430_v5 = vrot.slane %v2565_v15, %v4644_v34 }
 0x29e   : > { %v2428_v43 = vadd.f32 %v2427_v42, %v2326_v3  ;;  %v2470_v11 = vadd.f32 %v2469_v18, %v2328_v20 }
 0x29f   : > { %v2449_v17 = vadd.f32 %v2448_v41, %v2327_v38  ;;  %v2491_v2 = vadd.f32 %v2490_v36, %v2329_v28  ;;  %v2596_v30 = vcombine.low %v4425_v37, %v4430_v5 }
 0x2a0   : > { %v2429_v13 = vrot.slane %v2428_v43, 4  ;;  %v2471_v25 = vrot.slane %v2470_v11, 4 }
 0x2a1   : > { %v2450_v62 = vrot.slane %v2449_v17, 4  ;;  %v2492_v55 = vrot.slane %v2491_v2, 4  ;;  %v2604_v41 = vrot.slane %v2596_v30, %v4644_v34 }
 0x2a2   : > { %v2430_v48 = vadd.f32 %v2429_v13, %v2428_v43  ;;  %v2472_v57 = vadd.f32 %v2471_v25, %v2470_v11 }
 0x2a3   : > { %v2451_v1 = vadd.f32 %v2450_v62, %v2449_v17  ;;  %v2493_v29 = vadd.f32 %v2492_v55, %v2491_v2 }
 0x2a4   : > { %v2431_v46 = vrot.slane %v2430_v48, 2  ;;  %v2473_v50 = vrot.slane %v2472_v57, 2 }
 0x2a5   : > { %v2452_v9 = vrot.slane %v2451_v1, 2  ;;  %v2494_v21 = vrot.slane %v2493_v29, 2 }
 0x2a6   : > { %v2432_v31 = vadd.f32 %v2431_v46, %v2430_v48  ;;  %v2474_v56 = vadd.f32 %v2473_v50, %v2472_v57 }
 0x2a7   : > { %v2453_v0 = vadd.f32 %v2452_v9, %v2451_v1  ;;  %v2495_v40 = vadd.f32 %v2494_v21, %v2493_v29 }
 0x2a8   : > { %v2433_v26 = vrot.slane %v2432_v31, 1  ;;  %v2475_v14 = vrot.slane %v2474_v56, 1 }
 0x2a9   : > { %v2454_v47 = vrot.slane %v2453_v0, 1  ;;  %v2496_v4 = vrot.slane %v2495_v40, 1 }
 0x2aa   : > { %v2434_v23 = vadd.f32 %v2433_v26, %v2432_v31  ;;  %v2476_v58 = vadd.f32 %v2475_v14, %v2474_v56 }
 0x2ab   : > { %v2455_v12 = vadd.f32 %v2454_v47, %v2453_v0  ;;  %v2497_v45 = vadd.f32 %v2496_v4, %v2495_v40 }
 0x2ac   : > { %v2504_v10 = vadd.f32 %v4278_v52, %v2434_v23  ;;  %v2506_v22 = vadd.f32 %v4278_v52, %v2476_v58 }
 0x2ad   : > { %v2505_v7 = vadd.f32 %v4278_v52, %v2455_v12  ;;  %v2507_v54 = vadd.f32 %v4278_v52, %v2497_v45 }
 0x2ae   : > { %v2764_v53 = vmul.f32 -1.442695, %v2504_v10  ;;  %v2766_v33 = vmul.f32 -1.442695, %v2506_v22 }
 0x2af   : > { %v2765_v6 = vmul.f32 -1.442695, %v2505_v7  ;;  %v2767_v42 = vmul.f32 -1.442695, %v2507_v54 }
 0x2b0   : > { %2834 = vpow2.f32 %v2764_v53 }
 0x2b1   : > { %2836 = vpow2.f32 %v2766_v33 }
 0x2b2   : > { %2838 = vpow2.f32 %v2765_v6 }
 0x2b3   : > { %2840 = vpow2.f32 %v2767_v42 }
 0x2bd   : > { %v2835_v32 = vpop.eup %2834 }
 0x2be   : > { %v2837_v60 = vpop.eup %2836  ;;  %v2536_v19 = vadd.f32 1.0, %v2835_v32 }
 0x2bf   : > { %v2839_v27 = vpop.eup %2838  ;;  %v2538_v18 = vadd.f32 1.0, %v2837_v60 }
 0x2c0   : > { %v2841_v39 = vpop.eup %2840  ;;  %2842 = vrcp.f32 %v2536_v19  ;;  %v2537_v51 = vadd.f32 1.0, %v2839_v27 }
 0x2c1   : > { %2844 = vrcp.f32 %v2538_v18  ;;  %v2539_v52 = vadd.f32 1.0, %v2841_v39 }
 0x2c2   : > { %2846 = vrcp.f32 %v2537_v51 }
 0x2c3   : > { %2848 = vrcp.f32 %v2539_v52 }
 0x2cd   : > { %v2843_v24 = vpop.eup %2842 }
 0x2ce   : > { %v2845_v35 = vpop.eup %2844 }
 0x2cf   : > { %v2847_v44 = vpop.eup %2846 }
 0x2d0   : > { %v2849_v8 = vpop.eup %2848  ;;  %v2566_v63 = vcombine.low %v2843_v24, %v2847_v44 }
 0x2d1   : > { %v2567_v61 = vcombine.low %v2845_v35, %v2849_v8 }
 0x2d2   : > { %v2588_v16 = vrot.slane %v2566_v63, %v4644_v34 }
 0x2d3   : > { %v2595_v49 = vrot.slane %v2567_v61, %v4644_v34 }
 0x2d5   : > { %v2597_v15 = vcombine.low %v2588_v16, %v2595_v49 }
 0x2d7   : > { %v2611_v59 = vrot.slane %v2597_v15, %v4644_v34 }
 0x2d9   : > { %v2612_v3 = vcombine.low %v2604_v41, %v2611_v59 }
 0x2db   : > { %2614 = vst [vmem:[%s273_s18] sm:$0xff] %v2612_v3 }
 0x2dc   : > { %2863 = shalt.err (!%p2860_p3)
}
 0x2dd   : > { %s2864_s9 = scalar_lea.hbm %s2628_s22, 128  ;;  %s2868_s15 = scalar_lea.hbm %s4486_s7, 256 }
 0x2de   : > { %p2865_p4 = scmp.ne.s32.totalorder %s2628_s22, %s2864_s9  ;;  %p2869_p9 = scmp.lt.s32.totalorder %s2628_s22, %s4486_s7 }
 0x2df   : > { %p2870_p10 = scmp.lt.s32.totalorder %s2868_s15, %s2864_s9 }
 0x2e0   : > { %p2866_p7 = pnand %p2865_p4, %p2997_p5 }
 0x2e1   : > { %p2871_p11 = por %p2870_p10, %p2869_p9 }
 0x2e2   : > { %p2867_p8 = pneg %p2866_p7 }
 0x2e4   : > { %p2872_p12 = pnand %p2871_p11, %p2867_p8 }
 0x2e6   : > { %2875 = shalt.err (!%p2872_p12)
}
 0x2e7   : > { %2774 = dma.vmem_to_hbm [thread:$0]  (%p2997_p5), %s2631_s19, 128, %s2628_s22, %s2616_s23  }
 0x2e8 PF: > { %p2780_p13 = scmp.ge.s32.totalorder %s2910_s29, 2  ;;  %s2642_s18 = sand.u32 1, %s2898_s26  }
 0x2e9   : > { %s2643_s20 = scalar_lea.sflag [#allocation4], %s2642_s18 }
 0x2ea   : > { %p2777_p0 = pnand %p2780_p13, %p3001_p6 }
 0x2ec   : > { %p2778_p1 = pneg %p2777_p0 }
 0x2ee   : > { %2893 = dma.done.wait (%p2778_p1), %s2643_s20, 128  }
 0x2ef   : > { %2895 = vsyncadd (%p2778_p1), %s2643_s20, 4294967168  ;;  %p18_p2 = scmp.ge.s32.totalorder %s2984_s8, 4   ;;  %s4645_s26 = smov %s2902_s27 }
 0x2f0   : > { %s4646_s27 = smov %s2906_s28  ;;  %s4647_s28 = smov %s2995_s11 }
 0x2f1   : > { %s4648_s29 = smov %s2984_s8  ;;  %20 = sbr.rel (!%p18_p2) target bundleno = 5 (0x5), region = 83 }
 0x2f6   :  { %2648 = vsyncpa [#allocation4], 1 }
 0x2f7   :  { %2650 = vsyncpa [#allocation4 + $0x1], 1 }

</bundles_post_ra>
